<compile_context>
chip_gen: v6e
topology: v6e:2x2x1
jax: 0.10.0
libtpu: 0.0.40
codegen_flags: <defaults>
</compile_context>

<pallas_src>
import numpy as np
import jax
import jax.numpy as jnp
from jax.experimental import pallas as pl
from jax.experimental.pallas import tpu as pltpu

EPS = 1e-5
_ARGS_PER_LAYER = 6


def _conv_out(n):
    # 3x3 kernel, stride 2, padding 1.
    return (n + 2 - 3) // 2 + 1


def _prepare_layer(B, H, W, wgt, bias, gamma, beta):
    """Host-side precompute of one layer's kernel operands (all tiny, all f32)."""
    wgt = np.asarray(wgt, np.float32)
    bias = np.asarray(bias, np.float32)
    gamma = np.asarray(gamma, np.float32)
    beta = np.asarray(beta, np.float32)
    Cout, Cin, KH, KW = wgt.shape
    Ho, Wo = _conv_out(H), _conv_out(W)

    # Height gather: GH[kh, b*Ho+ho, b*H+h] = 1 iff h == 2*ho + kh - 1 (zero rows = padding).
    GH = np.zeros((KH, B * Ho, B * H), np.float32)
    for kh in range(KH):
        for b in range(B):
            for ho in range(Ho):
                h = 2 * ho + kh - 1
                if 0 <= h < H:
                    GH[kh, b * Ho + ho, b * H + h] = 1.0

    # U[kh] folds the width gather + kw tap-sum + conv weights: (W*Cin, Wo*Cout) per kh.
    w_taps = np.transpose(wgt, (2, 3, 1, 0))                     # (KH, KW, Cin, Cout)
    U = np.zeros((KH, W * Cin, Wo * Cout), np.float32)
    for kh in range(KH):
        for kw in range(KW):
            for wo in range(Wo):
                w_in = 2 * wo + kw - 1
                if 0 <= w_in < W:
                    U[kh, w_in * Cin:(w_in + 1) * Cin,
                      wo * Cout:(wo + 1) * Cout] += w_taps[kh, kw]

    eye = np.eye(Cout, dtype=np.float32)
    Pagg = np.tile(eye, (Wo, 1)) / np.float32(Wo)                # (Wo*Cout, Cout): mean over wo
    Pb = np.tile(eye, (1, Wo))                                   # (Cout, Wo*Cout): broadcast back
    bias_col = np.tile(bias.reshape(1, Cout), (1, Wo))           # (1, Wo*Cout)
    gb = np.stack([gamma, beta], axis=0)                         # (2, Cout)

    ops = tuple(jnp.asarray(a) for a in (U, GH, Pagg, Pb, bias_col, gb))
    return ops, Ho, Wo, Cout


def _fused_convnet_kernel(x_ref, *refs):
    """Fully fused forward pass.

    x_ref: (B*H, W*Cin0) input slab (rows = (b, h), cols = (w, c)).
    refs:  per layer: U (3, W*Cin, Wo*Cout), GH (3, B*Ho, B*H), Pagg (Wo*Cout, Cout),
           Pb (Cout, Wo*Cout), bias_col (1, Wo*Cout), gb (2, Cout); last ref is the output.
    """
    o_ref = refs[-1]
    layer_refs = refs[:-1]
    n_layers = len(layer_refs) // _ARGS_PER_LAYER

    act = x_ref[...]                                             # (B*H, W*Cin), f32
    for l in range(n_layers):
        u_ref, gh_ref, pagg_ref, pb_ref, bias_ref, gb_ref = layer_refs[
            _ARGS_PER_LAYER * l:_ARGS_PER_LAYER * (l + 1)]
        n_kh = gh_ref.shape[0]

        # Convolution: 2 MXU matmuls per kh tap, f32 accumulate.
        acc = None
        for kh in range(n_kh):
            t = jnp.dot(gh_ref[kh], act, preferred_element_type=jnp.float32)   # (B*Ho, W*Cin)
            c = jnp.dot(t, u_ref[kh], preferred_element_type=jnp.float32)      # (B*Ho, Wo*Cout)
            acc = c if acc is None else acc + c

        # Conv bias + ReLU (VPU).
        y = jnp.maximum(acc + bias_ref[...], 0.0)                              # (B*Ho, Wo*Cout)

        # Training-mode BatchNorm: batch stats over all (b, ho, wo), biased var, eps=1e-5.
        mean_col = jnp.mean(y, axis=0, keepdims=True)                          # (1, Wo*Cout)
        msq_col = jnp.mean(y * y, axis=0, keepdims=True)
        mean_c = jnp.dot(mean_col, pagg_ref[...], preferred_element_type=jnp.float32)  # (1, Cout)
        msq_c = jnp.dot(msq_col, pagg_ref[...], preferred_element_type=jnp.float32)
        var_c = jnp.maximum(msq_c - mean_c * mean_c, 0.0)
        gb = gb_ref[...]
        scale_c = gb[0:1, :] * jax.lax.rsqrt(var_c + EPS)                      # EUP rsqrt
        shift_c = gb[1:2, :] - mean_c * scale_c
        scale_col = jnp.dot(scale_c, pb_ref[...], preferred_element_type=jnp.float32)
        shift_col = jnp.dot(shift_c, pb_ref[...], preferred_element_type=jnp.float32)
        act = y * scale_col + shift_col                                        # next layer's A

    o_ref[...] = act


def prepare_conv_input_model(params, B, H, W):
    """Build all per-layer kernel operands on host. Returns (flat_arg_list, (Ho, Wo, Cout))."""
    flat = []
    h, w = H, W
    cout = params[-1][0].shape[0]
    for (wgt, bias, gamma, beta) in params:
        ops, ho, wo, cout = _prepare_layer(B, h, w, wgt, bias, gamma, beta)
        flat.extend(ops)
        h, w = ho, wo
    return flat, (h, w, cout)


def conv_input_model(img_nchw, layer_args, out_meta):
    """Forward pass equivalent to ConvInputModel.forward (NCHW in / NCHW out)."""
    B, C0, H, W = img_nchw.shape
    ho, wo, cout = out_meta
    x = jnp.transpose(img_nchw, (0, 2, 3, 1)).reshape(B * H, W * C0).astype(jnp.float32)

    args = [x] + list(layer_args)
    vmem = pl.BlockSpec(memory_space=pltpu.MemorySpace.VMEM)
    out2d = pl.pallas_call(
        _fused_convnet_kernel,
        out_shape=jax.ShapeDtypeStruct((B * ho, wo * cout), jnp.float32),
        in_specs=[vmem] * len(args),
        out_specs=vmem,
        compiler_params=pltpu.CompilerParams(vmem_limit_bytes=32 * 1024 * 1024),
    )(*args)

    return jnp.transpose(out2d.reshape(B, ho, wo, cout), (0, 3, 1, 2))


def init_params(key):
    """Deterministic parameter init matching the module's shapes (PyTorch-style uniform bounds)."""
    layer_io = [(24, 3), (24, 24), (24, 24), (24, 24)]
    params = []
    for i, (cout, cin) in enumerate(layer_io):
        kw_, kb_ = jax.random.split(jax.random.fold_in(key, i))
        fan_in = cin * 3 * 3
        bound = 1.0 / (fan_in ** 0.5)
        wgt = jax.random.uniform(kw_, (cout, cin, 3, 3), minval=-bound, maxval=bound,
                                 dtype=jnp.float32)
        b = jax.random.uniform(kb_, (cout,), minval=-bound, maxval=bound, dtype=jnp.float32)
        gamma = jnp.ones((cout,), jnp.float32)   # BatchNorm2d default weight
        beta = jnp.zeros((cout,), jnp.float32)   # BatchNorm2d default bias
        params.append((wgt, b, gamma, beta))
    return params


def _reference_forward(img, params):
    """Pure-JAX reference (conv -> bias -> ReLU -> training-mode BN) for validation."""
    x = img.astype(jnp.float32)
    for (wgt, bias, gamma, beta) in params:
        x = jax.lax.conv_general_dilated(
            x, wgt, window_strides=(2, 2), padding=((1, 1), (1, 1)),
            dimension_numbers=("NCHW", "OIHW", "NCHW"),
            precision=jax.lax.Precision.HIGHEST)
        x = jnp.maximum(x + bias.reshape(1, -1, 1, 1), 0.0)
        mean = jnp.mean(x, axis=(0, 2, 3), keepdims=True)
        var = jnp.mean(jnp.square(x - mean), axis=(0, 2, 3), keepdims=True)
        x = (x - mean) * jax.lax.rsqrt(var + EPS) * gamma.reshape(1, -1, 1, 1) \
            + beta.reshape(1, -1, 1, 1)
    return x


if __name__ == "__main__":
    key = jax.random.PRNGKey(0)
    k_img, k_par = jax.random.split(key)

    # Small input consistent with conv1 (3 input channels): 16x16 -> 8 -> 4 -> 2 -> 1 spatially.
    img = jax.random.normal(k_img, (2, 3, 16, 16), dtype=jnp.float32)
    params = init_params(k_par)

    layer_args, out_meta = prepare_conv_input_model(params, B=2, H=16, W=16)
    fwd = jax.jit(lambda x: conv_input_model(x, layer_args, out_meta))
    out = jax.block_until_ready(fwd(img))

    assert out.shape == (2, 24, 1, 1), out.shape
    assert bool(jnp.all(jnp.isfinite(out)))

    ref = _reference_forward(img, params)
    assert bool(jnp.allclose(out, ref, rtol=1e-2, atol=1e-2)), \
        float(jnp.max(jnp.abs(out - ref)))

    print("KERNEL_OK")
</pallas_src>

<mosaic_0001>
module attributes {stable_mosaic.version = 11 : i64} {
  func.func @_fused_convnet_kernel(%arg0: memref<32x48xf32, #tpu.memory_space<vmem>>, %arg1: memref<3x48x192xf32, #tpu.memory_space<vmem>>, %arg2: memref<3x16x32xf32, #tpu.memory_space<vmem>>, %arg3: memref<192x24xf32, #tpu.memory_space<vmem>>, %arg4: memref<24x192xf32, #tpu.memory_space<vmem>>, %arg5: memref<1x192xf32, #tpu.memory_space<vmem>>, %arg6: memref<2x24xf32, #tpu.memory_space<vmem>>, %arg7: memref<3x192x96xf32, #tpu.memory_space<vmem>>, %arg8: memref<3x8x16xf32, #tpu.memory_space<vmem>>, %arg9: memref<96x24xf32, #tpu.memory_space<vmem>>, %arg10: memref<24x96xf32, #tpu.memory_space<vmem>>, %arg11: memref<1x96xf32, #tpu.memory_space<vmem>>, %arg12: memref<2x24xf32, #tpu.memory_space<vmem>>, %arg13: memref<3x96x48xf32, #tpu.memory_space<vmem>>, %arg14: memref<3x4x8xf32, #tpu.memory_space<vmem>>, %arg15: memref<48x24xf32, #tpu.memory_space<vmem>>, %arg16: memref<24x48xf32, #tpu.memory_space<vmem>>, %arg17: memref<1x48xf32, #tpu.memory_space<vmem>>, %arg18: memref<2x24xf32, #tpu.memory_space<vmem>>, %arg19: memref<3x48x24xf32, #tpu.memory_space<vmem>>, %arg20: memref<3x2x4xf32, #tpu.memory_space<vmem>>, %arg21: memref<24x24xf32, #tpu.memory_space<vmem>>, %arg22: memref<24x24xf32, #tpu.memory_space<vmem>>, %arg23: memref<1x24xf32, #tpu.memory_space<vmem>>, %arg24: memref<2x24xf32, #tpu.memory_space<vmem>>, %arg25: memref<2x24xf32, #tpu.memory_space<vmem>>) attributes {dimension_semantics = [], scalar_prefetch = 0 : i64, scratch_operands = 0 : i64, tpu.core_type = #tpu.core_type<tc>} {
    %c0 = arith.constant 0 : index
    %c0_0 = arith.constant 0 : index
    %0 = vector.load %arg0[%c0, %c0_0] : memref<32x48xf32, #tpu.memory_space<vmem>>, vector<32x48xf32>
    %c0_1 = arith.constant 0 : index
    %c0_2 = arith.constant 0 : index
    %c0_3 = arith.constant 0 : index
    %1 = vector.load %arg2[%c0_1, %c0_2, %c0_3] : memref<3x16x32xf32, #tpu.memory_space<vmem>>, vector<1x16x32xf32>
    %2 = vector.shape_cast %1 : vector<1x16x32xf32> to vector<16x32xf32>
    %cst = arith.constant dense<0.000000e+00> : vector<16x48xf32>
    %3 = tpu.matmul %2, %0, %cst {dimension_numbers = #tpu.dot_dimension_numbers<[1], [0], [0], [1], [0, 0, 1, 1], [], []>} : vector<16x32xf32>, vector<32x48xf32>, vector<16x48xf32> -> vector<16x48xf32>
    %c0_4 = arith.constant 0 : index
    %c0_5 = arith.constant 0 : index
    %c0_6 = arith.constant 0 : index
    %4 = vector.load %arg1[%c0_4, %c0_5, %c0_6] : memref<3x48x192xf32, #tpu.memory_space<vmem>>, vector<1x48x192xf32>
    %5 = vector.shape_cast %4 : vector<1x48x192xf32> to vector<48x192xf32>
    %cst_7 = arith.constant dense<0.000000e+00> : vector<16x192xf32>
    %6 = tpu.matmul %3, %5, %cst_7 {dimension_numbers = #tpu.dot_dimension_numbers<[1], [0], [0], [1], [0, 0, 1, 1], [], []>} : vector<16x48xf32>, vector<48x192xf32>, vector<16x192xf32> -> vector<16x192xf32>
    %c1 = arith.constant 1 : index
    %c0_8 = arith.constant 0 : index
    %c0_9 = arith.constant 0 : index
    %7 = vector.load %arg2[%c1, %c0_8, %c0_9] : memref<3x16x32xf32, #tpu.memory_space<vmem>>, vector<1x16x32xf32>
    %8 = vector.shape_cast %7 : vector<1x16x32xf32> to vector<16x32xf32>
    %cst_10 = arith.constant dense<0.000000e+00> : vector<16x48xf32>
    %9 = tpu.matmul %8, %0, %cst_10 {dimension_numbers = #tpu.dot_dimension_numbers<[1], [0], [0], [1], [0, 0, 1, 1], [], []>} : vector<16x32xf32>, vector<32x48xf32>, vector<16x48xf32> -> vector<16x48xf32>
    %c1_11 = arith.constant 1 : index
    %c0_12 = arith.constant 0 : index
    %c0_13 = arith.constant 0 : index
    %10 = vector.load %arg1[%c1_11, %c0_12, %c0_13] : memref<3x48x192xf32, #tpu.memory_space<vmem>>, vector<1x48x192xf32>
    %11 = vector.shape_cast %10 : vector<1x48x192xf32> to vector<48x192xf32>
    %cst_14 = arith.constant dense<0.000000e+00> : vector<16x192xf32>
    %12 = tpu.matmul %9, %11, %cst_14 {dimension_numbers = #tpu.dot_dimension_numbers<[1], [0], [0], [1], [0, 0, 1, 1], [], []>} : vector<16x48xf32>, vector<48x192xf32>, vector<16x192xf32> -> vector<16x192xf32>
    %13 = arith.addf %6, %12 : vector<16x192xf32>
    %c2 = arith.constant 2 : index
    %c0_15 = arith.constant 0 : index
    %c0_16 = arith.constant 0 : index
    %14 = vector.load %arg2[%c2, %c0_15, %c0_16] : memref<3x16x32xf32, #tpu.memory_space<vmem>>, vector<1x16x32xf32>
    %15 = vector.shape_cast %14 : vector<1x16x32xf32> to vector<16x32xf32>
    %cst_17 = arith.constant dense<0.000000e+00> : vector<16x48xf32>
    %16 = tpu.matmul %15, %0, %cst_17 {dimension_numbers = #tpu.dot_dimension_numbers<[1], [0], [0], [1], [0, 0, 1, 1], [], []>} : vector<16x32xf32>, vector<32x48xf32>, vector<16x48xf32> -> vector<16x48xf32>
    %c2_18 = arith.constant 2 : index
    %c0_19 = arith.constant 0 : index
    %c0_20 = arith.constant 0 : index
    %17 = vector.load %arg1[%c2_18, %c0_19, %c0_20] : memref<3x48x192xf32, #tpu.memory_space<vmem>>, vector<1x48x192xf32>
    %18 = vector.shape_cast %17 : vector<1x48x192xf32> to vector<48x192xf32>
    %cst_21 = arith.constant dense<0.000000e+00> : vector<16x192xf32>
    %19 = tpu.matmul %16, %18, %cst_21 {dimension_numbers = #tpu.dot_dimension_numbers<[1], [0], [0], [1], [0, 0, 1, 1], [], []>} : vector<16x48xf32>, vector<48x192xf32>, vector<16x192xf32> -> vector<16x192xf32>
    %20 = arith.addf %13, %19 : vector<16x192xf32>
    %c0_22 = arith.constant 0 : index
    %c0_23 = arith.constant 0 : index
    %21 = vector.load %arg5[%c0_22, %c0_23] : memref<1x192xf32, #tpu.memory_space<vmem>>, vector<1x192xf32>
    %22 = vector.broadcast %21 : vector<1x192xf32> to vector<16x192xf32>
    %23 = arith.addf %20, %22 : vector<16x192xf32>
    %cst_24 = arith.constant 0.000000e+00 : f32
    %24 = vector.broadcast %cst_24 : f32 to vector<16x192xf32>
    %25 = arith.maximumf %23, %24 : vector<16x192xf32>
    %cst_25 = arith.constant dense<0.000000e+00> : vector<192xf32>
    %26 = vector.multi_reduction <add>, %25, %cst_25 [0] : vector<16x192xf32> to vector<192xf32>
    %27 = vector.shape_cast %26 : vector<192xf32> to vector<1x192xf32>
    %cst_26 = arith.constant 1.600000e+01 : f32
    %28 = vector.broadcast %cst_26 : f32 to vector<1x192xf32>
    %29 = arith.divf %27, %28 : vector<1x192xf32>
    %30 = arith.mulf %25, %25 : vector<16x192xf32>
    %cst_27 = arith.constant dense<0.000000e+00> : vector<192xf32>
    %31 = vector.multi_reduction <add>, %30, %cst_27 [0] : vector<16x192xf32> to vector<192xf32>
    %32 = vector.shape_cast %31 : vector<192xf32> to vector<1x192xf32>
    %cst_28 = arith.constant 1.600000e+01 : f32
    %33 = vector.broadcast %cst_28 : f32 to vector<1x192xf32>
    %34 = arith.divf %32, %33 : vector<1x192xf32>
    %c0_29 = arith.constant 0 : index
    %c0_30 = arith.constant 0 : index
    %35 = vector.load %arg3[%c0_29, %c0_30] : memref<192x24xf32, #tpu.memory_space<vmem>>, vector<192x24xf32>
    %cst_31 = arith.constant dense<0.000000e+00> : vector<1x24xf32>
    %36 = tpu.matmul %29, %35, %cst_31 {dimension_numbers = #tpu.dot_dimension_numbers<[1], [0], [0], [1], [0, 0, 1, 1], [], []>} : vector<1x192xf32>, vector<192x24xf32>, vector<1x24xf32> -> vector<1x24xf32>
    %c0_32 = arith.constant 0 : index
    %c0_33 = arith.constant 0 : index
    %37 = vector.load %arg3[%c0_32, %c0_33] : memref<192x24xf32, #tpu.memory_space<vmem>>, vector<192x24xf32>
    %cst_34 = arith.constant dense<0.000000e+00> : vector<1x24xf32>
    %38 = tpu.matmul %34, %37, %cst_34 {dimension_numbers = #tpu.dot_dimension_numbers<[1], [0], [0], [1], [0, 0, 1, 1], [], []>} : vector<1x192xf32>, vector<192x24xf32>, vector<1x24xf32> -> vector<1x24xf32>
    %39 = arith.mulf %36, %36 : vector<1x24xf32>
    %40 = arith.subf %38, %39 : vector<1x24xf32>
    %cst_35 = arith.constant 0.000000e+00 : f32
    %41 = vector.broadcast %cst_35 : f32 to vector<1x24xf32>
    %42 = arith.maximumf %40, %41 : vector<1x24xf32>
    %c0_36 = arith.constant 0 : index
    %c0_37 = arith.constant 0 : index
    %43 = vector.load %arg6[%c0_36, %c0_37] : memref<2x24xf32, #tpu.memory_space<vmem>>, vector<2x24xf32>
    %44 = vector.extract_strided_slice %43 {offsets = [0, 0], sizes = [1, 24], strides = [1, 1]} : vector<2x24xf32> to vector<1x24xf32>
    %cst_38 = arith.constant 9.99999974E-6 : f32
    %45 = vector.broadcast %cst_38 : f32 to vector<1x24xf32>
    %46 = arith.addf %42, %45 : vector<1x24xf32>
    %47 = math.rsqrt %46 : vector<1x24xf32>
    %48 = arith.mulf %44, %47 : vector<1x24xf32>
    %49 = vector.extract_strided_slice %43 {offsets = [1, 0], sizes = [1, 24], strides = [1, 1]} : vector<2x24xf32> to vector<1x24xf32>
    %50 = arith.mulf %36, %48 : vector<1x24xf32>
    %51 = arith.subf %49, %50 : vector<1x24xf32>
    %c0_39 = arith.constant 0 : index
    %c0_40 = arith.constant 0 : index
    %52 = vector.load %arg4[%c0_39, %c0_40] : memref<24x192xf32, #tpu.memory_space<vmem>>, vector<24x192xf32>
    %cst_41 = arith.constant dense<0.000000e+00> : vector<1x192xf32>
    %53 = tpu.matmul %48, %52, %cst_41 {dimension_numbers = #tpu.dot_dimension_numbers<[1], [0], [0], [1], [0, 0, 1, 1], [], []>} : vector<1x24xf32>, vector<24x192xf32>, vector<1x192xf32> -> vector<1x192xf32>
    %c0_42 = arith.constant 0 : index
    %c0_43 = arith.constant 0 : index
    %54 = vector.load %arg4[%c0_42, %c0_43] : memref<24x192xf32, #tpu.memory_space<vmem>>, vector<24x192xf32>
    %cst_44 = arith.constant dense<0.000000e+00> : vector<1x192xf32>
    %55 = tpu.matmul %51, %54, %cst_44 {dimension_numbers = #tpu.dot_dimension_numbers<[1], [0], [0], [1], [0, 0, 1, 1], [], []>} : vector<1x24xf32>, vector<24x192xf32>, vector<1x192xf32> -> vector<1x192xf32>
    %56 = vector.broadcast %53 : vector<1x192xf32> to vector<16x192xf32>
    %57 = arith.mulf %25, %56 : vector<16x192xf32>
    %58 = vector.broadcast %55 : vector<1x192xf32> to vector<16x192xf32>
    %59 = arith.addf %57, %58 : vector<16x192xf32>
    %c0_45 = arith.constant 0 : index
    %c0_46 = arith.constant 0 : index
    %c0_47 = arith.constant 0 : index
    %60 = vector.load %arg8[%c0_45, %c0_46, %c0_47] : memref<3x8x16xf32, #tpu.memory_space<vmem>>, vector<1x8x16xf32>
    %61 = vector.shape_cast %60 : vector<1x8x16xf32> to vector<8x16xf32>
    %cst_48 = arith.constant dense<0.000000e+00> : vector<8x192xf32>
    %62 = tpu.matmul %61, %59, %cst_48 {dimension_numbers = #tpu.dot_dimension_numbers<[1], [0], [0], [1], [0, 0, 1, 1], [], []>} : vector<8x16xf32>, vector<16x192xf32>, vector<8x192xf32> -> vector<8x192xf32>
    %c0_49 = arith.constant 0 : index
    %c0_50 = arith.constant 0 : index
    %c0_51 = arith.constant 0 : index
    %63 = vector.load %arg7[%c0_49, %c0_50, %c0_51] : memref<3x192x96xf32, #tpu.memory_space<vmem>>, vector<1x192x96xf32>
    %64 = vector.shape_cast %63 : vector<1x192x96xf32> to vector<192x96xf32>
    %cst_52 = arith.constant dense<0.000000e+00> : vector<8x96xf32>
    %65 = tpu.matmul %62, %64, %cst_52 {dimension_numbers = #tpu.dot_dimension_numbers<[1], [0], [0], [1], [0, 0, 1, 1], [], []>} : vector<8x192xf32>, vector<192x96xf32>, vector<8x96xf32> -> vector<8x96xf32>
    %c1_53 = arith.constant 1 : index
    %c0_54 = arith.constant 0 : index
    %c0_55 = arith.constant 0 : index
    %66 = vector.load %arg8[%c1_53, %c0_54, %c0_55] : memref<3x8x16xf32, #tpu.memory_space<vmem>>, vector<1x8x16xf32>
    %67 = vector.shape_cast %66 : vector<1x8x16xf32> to vector<8x16xf32>
    %cst_56 = arith.constant dense<0.000000e+00> : vector<8x192xf32>
    %68 = tpu.matmul %67, %59, %cst_56 {dimension_numbers = #tpu.dot_dimension_numbers<[1], [0], [0], [1], [0, 0, 1, 1], [], []>} : vector<8x16xf32>, vector<16x192xf32>, vector<8x192xf32> -> vector<8x192xf32>
    %c1_57 = arith.constant 1 : index
    %c0_58 = arith.constant 0 : index
    %c0_59 = arith.constant 0 : index
    %69 = vector.load %arg7[%c1_57, %c0_58, %c0_59] : memref<3x192x96xf32, #tpu.memory_space<vmem>>, vector<1x192x96xf32>
    %70 = vector.shape_cast %69 : vector<1x192x96xf32> to vector<192x96xf32>
    %cst_60 = arith.constant dense<0.000000e+00> : vector<8x96xf32>
    %71 = tpu.matmul %68, %70, %cst_60 {dimension_numbers = #tpu.dot_dimension_numbers<[1], [0], [0], [1], [0, 0, 1, 1], [], []>} : vector<8x192xf32>, vector<192x96xf32>, vector<8x96xf32> -> vector<8x96xf32>
    %72 = arith.addf %65, %71 : vector<8x96xf32>
    %c2_61 = arith.constant 2 : index
    %c0_62 = arith.constant 0 : index
    %c0_63 = arith.constant 0 : index
    %73 = vector.load %arg8[%c2_61, %c0_62, %c0_63] : memref<3x8x16xf32, #tpu.memory_space<vmem>>, vector<1x8x16xf32>
    %74 = vector.shape_cast %73 : vector<1x8x16xf32> to vector<8x16xf32>
    %cst_64 = arith.constant dense<0.000000e+00> : vector<8x192xf32>
    %75 = tpu.matmul %74, %59, %cst_64 {dimension_numbers = #tpu.dot_dimension_numbers<[1], [0], [0], [1], [0, 0, 1, 1], [], []>} : vector<8x16xf32>, vector<16x192xf32>, vector<8x192xf32> -> vector<8x192xf32>
    %c2_65 = arith.constant 2 : index
    %c0_66 = arith.constant 0 : index
    %c0_67 = arith.constant 0 : index
    %76 = vector.load %arg7[%c2_65, %c0_66, %c0_67] : memref<3x192x96xf32, #tpu.memory_space<vmem>>, vector<1x192x96xf32>
    %77 = vector.shape_cast %76 : vector<1x192x96xf32> to vector<192x96xf32>
    %cst_68 = arith.constant dense<0.000000e+00> : vector<8x96xf32>
    %78 = tpu.matmul %75, %77, %cst_68 {dimension_numbers = #tpu.dot_dimension_numbers<[1], [0], [0], [1], [0, 0, 1, 1], [], []>} : vector<8x192xf32>, vector<192x96xf32>, vector<8x96xf32> -> vector<8x96xf32>
    %79 = arith.addf %72, %78 : vector<8x96xf32>
    %c0_69 = arith.constant 0 : index
    %c0_70 = arith.constant 0 : index
    %80 = vector.load %arg11[%c0_69, %c0_70] : memref<1x96xf32, #tpu.memory_space<vmem>>, vector<1x96xf32>
    %81 = vector.broadcast %80 : vector<1x96xf32> to vector<8x96xf32>
    %82 = arith.addf %79, %81 : vector<8x96xf32>
    %cst_71 = arith.constant 0.000000e+00 : f32
    %83 = vector.broadcast %cst_71 : f32 to vector<8x96xf32>
    %84 = arith.maximumf %82, %83 : vector<8x96xf32>
    %cst_72 = arith.constant dense<0.000000e+00> : vector<96xf32>
    %85 = vector.multi_reduction <add>, %84, %cst_72 [0] : vector<8x96xf32> to vector<96xf32>
    %86 = vector.shape_cast %85 : vector<96xf32> to vector<1x96xf32>
    %cst_73 = arith.constant 8.000000e+00 : f32
    %87 = vector.broadcast %cst_73 : f32 to vector<1x96xf32>
    %88 = arith.divf %86, %87 : vector<1x96xf32>
    %89 = arith.mulf %84, %84 : vector<8x96xf32>
    %cst_74 = arith.constant dense<0.000000e+00> : vector<96xf32>
    %90 = vector.multi_reduction <add>, %89, %cst_74 [0] : vector<8x96xf32> to vector<96xf32>
    %91 = vector.shape_cast %90 : vector<96xf32> to vector<1x96xf32>
    %cst_75 = arith.constant 8.000000e+00 : f32
    %92 = vector.broadcast %cst_75 : f32 to vector<1x96xf32>
    %93 = arith.divf %91, %92 : vector<1x96xf32>
    %c0_76 = arith.constant 0 : index
    %c0_77 = arith.constant 0 : index
    %94 = vector.load %arg9[%c0_76, %c0_77] : memref<96x24xf32, #tpu.memory_space<vmem>>, vector<96x24xf32>
    %cst_78 = arith.constant dense<0.000000e+00> : vector<1x24xf32>
    %95 = tpu.matmul %88, %94, %cst_78 {dimension_numbers = #tpu.dot_dimension_numbers<[1], [0], [0], [1], [0, 0, 1, 1], [], []>} : vector<1x96xf32>, vector<96x24xf32>, vector<1x24xf32> -> vector<1x24xf32>
    %c0_79 = arith.constant 0 : index
    %c0_80 = arith.constant 0 : index
    %96 = vector.load %arg9[%c0_79, %c0_80] : memref<96x24xf32, #tpu.memory_space<vmem>>, vector<96x24xf32>
    %cst_81 = arith.constant dense<0.000000e+00> : vector<1x24xf32>
    %97 = tpu.matmul %93, %96, %cst_81 {dimension_numbers = #tpu.dot_dimension_numbers<[1], [0], [0], [1], [0, 0, 1, 1], [], []>} : vector<1x96xf32>, vector<96x24xf32>, vector<1x24xf32> -> vector<1x24xf32>
    %98 = arith.mulf %95, %95 : vector<1x24xf32>
    %99 = arith.subf %97, %98 : vector<1x24xf32>
    %cst_82 = arith.constant 0.000000e+00 : f32
    %100 = vector.broadcast %cst_82 : f32 to vector<1x24xf32>
    %101 = arith.maximumf %99, %100 : vector<1x24xf32>
    %c0_83 = arith.constant 0 : index
    %c0_84 = arith.constant 0 : index
    %102 = vector.load %arg12[%c0_83, %c0_84] : memref<2x24xf32, #tpu.memory_space<vmem>>, vector<2x24xf32>
    %103 = vector.extract_strided_slice %102 {offsets = [0, 0], sizes = [1, 24], strides = [1, 1]} : vector<2x24xf32> to vector<1x24xf32>
    %cst_85 = arith.constant 9.99999974E-6 : f32
    %104 = vector.broadcast %cst_85 : f32 to vector<1x24xf32>
    %105 = arith.addf %101, %104 : vector<1x24xf32>
    %106 = math.rsqrt %105 : vector<1x24xf32>
    %107 = arith.mulf %103, %106 : vector<1x24xf32>
    %108 = vector.extract_strided_slice %102 {offsets = [1, 0], sizes = [1, 24], strides = [1, 1]} : vector<2x24xf32> to vector<1x24xf32>
    %109 = arith.mulf %95, %107 : vector<1x24xf32>
    %110 = arith.subf %108, %109 : vector<1x24xf32>
    %c0_86 = arith.constant 0 : index
    %c0_87 = arith.constant 0 : index
    %111 = vector.load %arg10[%c0_86, %c0_87] : memref<24x96xf32, #tpu.memory_space<vmem>>, vector<24x96xf32>
    %cst_88 = arith.constant dense<0.000000e+00> : vector<1x96xf32>
    %112 = tpu.matmul %107, %111, %cst_88 {dimension_numbers = #tpu.dot_dimension_numbers<[1], [0], [0], [1], [0, 0, 1, 1], [], []>} : vector<1x24xf32>, vector<24x96xf32>, vector<1x96xf32> -> vector<1x96xf32>
    %c0_89 = arith.constant 0 : index
    %c0_90 = arith.constant 0 : index
    %113 = vector.load %arg10[%c0_89, %c0_90] : memref<24x96xf32, #tpu.memory_space<vmem>>, vector<24x96xf32>
    %cst_91 = arith.constant dense<0.000000e+00> : vector<1x96xf32>
    %114 = tpu.matmul %110, %113, %cst_91 {dimension_numbers = #tpu.dot_dimension_numbers<[1], [0], [0], [1], [0, 0, 1, 1], [], []>} : vector<1x24xf32>, vector<24x96xf32>, vector<1x96xf32> -> vector<1x96xf32>
    %115 = vector.broadcast %112 : vector<1x96xf32> to vector<8x96xf32>
    %116 = arith.mulf %84, %115 : vector<8x96xf32>
    %117 = vector.broadcast %114 : vector<1x96xf32> to vector<8x96xf32>
    %118 = arith.addf %116, %117 : vector<8x96xf32>
    %c0_92 = arith.constant 0 : index
    %c0_93 = arith.constant 0 : index
    %c0_94 = arith.constant 0 : index
    %119 = vector.load %arg14[%c0_92, %c0_93, %c0_94] : memref<3x4x8xf32, #tpu.memory_space<vmem>>, vector<1x4x8xf32>
    %120 = vector.shape_cast %119 : vector<1x4x8xf32> to vector<4x8xf32>
    %cst_95 = arith.constant dense<0.000000e+00> : vector<4x96xf32>
    %121 = tpu.matmul %120, %118, %cst_95 {dimension_numbers = #tpu.dot_dimension_numbers<[1], [0], [0], [1], [0, 0, 1, 1], [], []>} : vector<4x8xf32>, vector<8x96xf32>, vector<4x96xf32> -> vector<4x96xf32>
    %c0_96 = arith.constant 0 : index
    %c0_97 = arith.constant 0 : index
    %c0_98 = arith.constant 0 : index
    %122 = vector.load %arg13[%c0_96, %c0_97, %c0_98] : memref<3x96x48xf32, #tpu.memory_space<vmem>>, vector<1x96x48xf32>
    %123 = vector.shape_cast %122 : vector<1x96x48xf32> to vector<96x48xf32>
    %cst_99 = arith.constant dense<0.000000e+00> : vector<4x48xf32>
    %124 = tpu.matmul %121, %123, %cst_99 {dimension_numbers = #tpu.dot_dimension_numbers<[1], [0], [0], [1], [0, 0, 1, 1], [], []>} : vector<4x96xf32>, vector<96x48xf32>, vector<4x48xf32> -> vector<4x48xf32>
    %c1_100 = arith.constant 1 : index
    %c0_101 = arith.constant 0 : index
    %c0_102 = arith.constant 0 : index
    %125 = vector.load %arg14[%c1_100, %c0_101, %c0_102] : memref<3x4x8xf32, #tpu.memory_space<vmem>>, vector<1x4x8xf32>
    %126 = vector.shape_cast %125 : vector<1x4x8xf32> to vector<4x8xf32>
    %cst_103 = arith.constant dense<0.000000e+00> : vector<4x96xf32>
    %127 = tpu.matmul %126, %118, %cst_103 {dimension_numbers = #tpu.dot_dimension_numbers<[1], [0], [0], [1], [0, 0, 1, 1], [], []>} : vector<4x8xf32>, vector<8x96xf32>, vector<4x96xf32> -> vector<4x96xf32>
    %c1_104 = arith.constant 1 : index
    %c0_105 = arith.constant 0 : index
    %c0_106 = arith.constant 0 : index
    %128 = vector.load %arg13[%c1_104, %c0_105, %c0_106] : memref<3x96x48xf32, #tpu.memory_space<vmem>>, vector<1x96x48xf32>
    %129 = vector.shape_cast %128 : vector<1x96x48xf32> to vector<96x48xf32>
    %cst_107 = arith.constant dense<0.000000e+00> : vector<4x48xf32>
    %130 = tpu.matmul %127, %129, %cst_107 {dimension_numbers = #tpu.dot_dimension_numbers<[1], [0], [0], [1], [0, 0, 1, 1], [], []>} : vector<4x96xf32>, vector<96x48xf32>, vector<4x48xf32> -> vector<4x48xf32>
    %131 = arith.addf %124, %130 : vector<4x48xf32>
    %c2_108 = arith.constant 2 : index
    %c0_109 = arith.constant 0 : index
    %c0_110 = arith.constant 0 : index
    %132 = vector.load %arg14[%c2_108, %c0_109, %c0_110] : memref<3x4x8xf32, #tpu.memory_space<vmem>>, vector<1x4x8xf32>
    %133 = vector.shape_cast %132 : vector<1x4x8xf32> to vector<4x8xf32>
    %cst_111 = arith.constant dense<0.000000e+00> : vector<4x96xf32>
    %134 = tpu.matmul %133, %118, %cst_111 {dimension_numbers = #tpu.dot_dimension_numbers<[1], [0], [0], [1], [0, 0, 1, 1], [], []>} : vector<4x8xf32>, vector<8x96xf32>, vector<4x96xf32> -> vector<4x96xf32>
    %c2_112 = arith.constant 2 : index
    %c0_113 = arith.constant 0 : index
    %c0_114 = arith.constant 0 : index
    %135 = vector.load %arg13[%c2_112, %c0_113, %c0_114] : memref<3x96x48xf32, #tpu.memory_space<vmem>>, vector<1x96x48xf32>
    %136 = vector.shape_cast %135 : vector<1x96x48xf32> to vector<96x48xf32>
    %cst_115 = arith.constant dense<0.000000e+00> : vector<4x48xf32>
    %137 = tpu.matmul %134, %136, %cst_115 {dimension_numbers = #tpu.dot_dimension_numbers<[1], [0], [0], [1], [0, 0, 1, 1], [], []>} : vector<4x96xf32>, vector<96x48xf32>, vector<4x48xf32> -> vector<4x48xf32>
    %138 = arith.addf %131, %137 : vector<4x48xf32>
    %c0_116 = arith.constant 0 : index
    %c0_117 = arith.constant 0 : index
    %139 = vector.load %arg17[%c0_116, %c0_117] : memref<1x48xf32, #tpu.memory_space<vmem>>, vector<1x48xf32>
    %140 = vector.broadcast %139 : vector<1x48xf32> to vector<4x48xf32>
    %141 = arith.addf %138, %140 : vector<4x48xf32>
    %cst_118 = arith.constant 0.000000e+00 : f32
    %142 = vector.broadcast %cst_118 : f32 to vector<4x48xf32>
    %143 = arith.maximumf %141, %142 : vector<4x48xf32>
    %cst_119 = arith.constant dense<0.000000e+00> : vector<48xf32>
    %144 = vector.multi_reduction <add>, %143, %cst_119 [0] : vector<4x48xf32> to vector<48xf32>
    %145 = vector.shape_cast %144 : vector<48xf32> to vector<1x48xf32>
    %cst_120 = arith.constant 4.000000e+00 : f32
    %146 = vector.broadcast %cst_120 : f32 to vector<1x48xf32>
    %147 = arith.divf %145, %146 : vector<1x48xf32>
    %148 = arith.mulf %143, %143 : vector<4x48xf32>
    %cst_121 = arith.constant dense<0.000000e+00> : vector<48xf32>
    %149 = vector.multi_reduction <add>, %148, %cst_121 [0] : vector<4x48xf32> to vector<48xf32>
    %150 = vector.shape_cast %149 : vector<48xf32> to vector<1x48xf32>
    %cst_122 = arith.constant 4.000000e+00 : f32
    %151 = vector.broadcast %cst_122 : f32 to vector<1x48xf32>
    %152 = arith.divf %150, %151 : vector<1x48xf32>
    %c0_123 = arith.constant 0 : index
    %c0_124 = arith.constant 0 : index
    %153 = vector.load %arg15[%c0_123, %c0_124] : memref<48x24xf32, #tpu.memory_space<vmem>>, vector<48x24xf32>
    %cst_125 = arith.constant dense<0.000000e+00> : vector<1x24xf32>
    %154 = tpu.matmul %147, %153, %cst_125 {dimension_numbers = #tpu.dot_dimension_numbers<[1], [0], [0], [1], [0, 0, 1, 1], [], []>} : vector<1x48xf32>, vector<48x24xf32>, vector<1x24xf32> -> vector<1x24xf32>
    %c0_126 = arith.constant 0 : index
    %c0_127 = arith.constant 0 : index
    %155 = vector.load %arg15[%c0_126, %c0_127] : memref<48x24xf32, #tpu.memory_space<vmem>>, vector<48x24xf32>
    %cst_128 = arith.constant dense<0.000000e+00> : vector<1x24xf32>
    %156 = tpu.matmul %152, %155, %cst_128 {dimension_numbers = #tpu.dot_dimension_numbers<[1], [0], [0], [1], [0, 0, 1, 1], [], []>} : vector<1x48xf32>, vector<48x24xf32>, vector<1x24xf32> -> vector<1x24xf32>
    %157 = arith.mulf %154, %154 : vector<1x24xf32>
    %158 = arith.subf %156, %157 : vector<1x24xf32>
    %cst_129 = arith.constant 0.000000e+00 : f32
    %159 = vector.broadcast %cst_129 : f32 to vector<1x24xf32>
    %160 = arith.maximumf %158, %159 : vector<1x24xf32>
    %c0_130 = arith.constant 0 : index
    %c0_131 = arith.constant 0 : index
    %161 = vector.load %arg18[%c0_130, %c0_131] : memref<2x24xf32, #tpu.memory_space<vmem>>, vector<2x24xf32>
    %162 = vector.extract_strided_slice %161 {offsets = [0, 0], sizes = [1, 24], strides = [1, 1]} : vector<2x24xf32> to vector<1x24xf32>
    %cst_132 = arith.constant 9.99999974E-6 : f32
    %163 = vector.broadcast %cst_132 : f32 to vector<1x24xf32>
    %164 = arith.addf %160, %163 : vector<1x24xf32>
    %165 = math.rsqrt %164 : vector<1x24xf32>
    %166 = arith.mulf %162, %165 : vector<1x24xf32>
    %167 = vector.extract_strided_slice %161 {offsets = [1, 0], sizes = [1, 24], strides = [1, 1]} : vector<2x24xf32> to vector<1x24xf32>
    %168 = arith.mulf %154, %166 : vector<1x24xf32>
    %169 = arith.subf %167, %168 : vector<1x24xf32>
    %c0_133 = arith.constant 0 : index
    %c0_134 = arith.constant 0 : index
    %170 = vector.load %arg16[%c0_133, %c0_134] : memref<24x48xf32, #tpu.memory_space<vmem>>, vector<24x48xf32>
    %cst_135 = arith.constant dense<0.000000e+00> : vector<1x48xf32>
    %171 = tpu.matmul %166, %170, %cst_135 {dimension_numbers = #tpu.dot_dimension_numbers<[1], [0], [0], [1], [0, 0, 1, 1], [], []>} : vector<1x24xf32>, vector<24x48xf32>, vector<1x48xf32> -> vector<1x48xf32>
    %c0_136 = arith.constant 0 : index
    %c0_137 = arith.constant 0 : index
    %172 = vector.load %arg16[%c0_136, %c0_137] : memref<24x48xf32, #tpu.memory_space<vmem>>, vector<24x48xf32>
    %cst_138 = arith.constant dense<0.000000e+00> : vector<1x48xf32>
    %173 = tpu.matmul %169, %172, %cst_138 {dimension_numbers = #tpu.dot_dimension_numbers<[1], [0], [0], [1], [0, 0, 1, 1], [], []>} : vector<1x24xf32>, vector<24x48xf32>, vector<1x48xf32> -> vector<1x48xf32>
    %174 = vector.broadcast %171 : vector<1x48xf32> to vector<4x48xf32>
    %175 = arith.mulf %143, %174 : vector<4x48xf32>
    %176 = vector.broadcast %173 : vector<1x48xf32> to vector<4x48xf32>
    %177 = arith.addf %175, %176 : vector<4x48xf32>
    %c0_139 = arith.constant 0 : index
    %c0_140 = arith.constant 0 : index
    %c0_141 = arith.constant 0 : index
    %178 = vector.load %arg20[%c0_139, %c0_140, %c0_141] : memref<3x2x4xf32, #tpu.memory_space<vmem>>, vector<1x2x4xf32>
    %179 = vector.shape_cast %178 : vector<1x2x4xf32> to vector<2x4xf32>
    %cst_142 = arith.constant dense<0.000000e+00> : vector<2x48xf32>
    %180 = tpu.matmul %179, %177, %cst_142 {dimension_numbers = #tpu.dot_dimension_numbers<[1], [0], [0], [1], [0, 0, 1, 1], [], []>} : vector<2x4xf32>, vector<4x48xf32>, vector<2x48xf32> -> vector<2x48xf32>
    %c0_143 = arith.constant 0 : index
    %c0_144 = arith.constant 0 : index
    %c0_145 = arith.constant 0 : index
    %181 = vector.load %arg19[%c0_143, %c0_144, %c0_145] : memref<3x48x24xf32, #tpu.memory_space<vmem>>, vector<1x48x24xf32>
    %182 = vector.shape_cast %181 : vector<1x48x24xf32> to vector<48x24xf32>
    %cst_146 = arith.constant dense<0.000000e+00> : vector<2x24xf32>
    %183 = tpu.matmul %180, %182, %cst_146 {dimension_numbers = #tpu.dot_dimension_numbers<[1], [0], [0], [1], [0, 0, 1, 1], [], []>} : vector<2x48xf32>, vector<48x24xf32>, vector<2x24xf32> -> vector<2x24xf32>
    %c1_147 = arith.constant 1 : index
    %c0_148 = arith.constant 0 : index
    %c0_149 = arith.constant 0 : index
    %184 = vector.load %arg20[%c1_147, %c0_148, %c0_149] : memref<3x2x4xf32, #tpu.memory_space<vmem>>, vector<1x2x4xf32>
    %185 = vector.shape_cast %184 : vector<1x2x4xf32> to vector<2x4xf32>
    %cst_150 = arith.constant dense<0.000000e+00> : vector<2x48xf32>
    %186 = tpu.matmul %185, %177, %cst_150 {dimension_numbers = #tpu.dot_dimension_numbers<[1], [0], [0], [1], [0, 0, 1, 1], [], []>} : vector<2x4xf32>, vector<4x48xf32>, vector<2x48xf32> -> vector<2x48xf32>
    %c1_151 = arith.constant 1 : index
    %c0_152 = arith.constant 0 : index
    %c0_153 = arith.constant 0 : index
    %187 = vector.load %arg19[%c1_151, %c0_152, %c0_153] : memref<3x48x24xf32, #tpu.memory_space<vmem>>, vector<1x48x24xf32>
    %188 = vector.shape_cast %187 : vector<1x48x24xf32> to vector<48x24xf32>
    %cst_154 = arith.constant dense<0.000000e+00> : vector<2x24xf32>
    %189 = tpu.matmul %186, %188, %cst_154 {dimension_numbers = #tpu.dot_dimension_numbers<[1], [0], [0], [1], [0, 0, 1, 1], [], []>} : vector<2x48xf32>, vector<48x24xf32>, vector<2x24xf32> -> vector<2x24xf32>
    %190 = arith.addf %183, %189 : vector<2x24xf32>
    %c2_155 = arith.constant 2 : index
    %c0_156 = arith.constant 0 : index
    %c0_157 = arith.constant 0 : index
    %191 = vector.load %arg20[%c2_155, %c0_156, %c0_157] : memref<3x2x4xf32, #tpu.memory_space<vmem>>, vector<1x2x4xf32>
    %192 = vector.shape_cast %191 : vector<1x2x4xf32> to vector<2x4xf32>
    %cst_158 = arith.constant dense<0.000000e+00> : vector<2x48xf32>
    %193 = tpu.matmul %192, %177, %cst_158 {dimension_numbers = #tpu.dot_dimension_numbers<[1], [0], [0], [1], [0, 0, 1, 1], [], []>} : vector<2x4xf32>, vector<4x48xf32>, vector<2x48xf32> -> vector<2x48xf32>
    %c2_159 = arith.constant 2 : index
    %c0_160 = arith.constant 0 : index
    %c0_161 = arith.constant 0 : index
    %194 = vector.load %arg19[%c2_159, %c0_160, %c0_161] : memref<3x48x24xf32, #tpu.memory_space<vmem>>, vector<1x48x24xf32>
    %195 = vector.shape_cast %194 : vector<1x48x24xf32> to vector<48x24xf32>
    %cst_162 = arith.constant dense<0.000000e+00> : vector<2x24xf32>
    %196 = tpu.matmul %193, %195, %cst_162 {dimension_numbers = #tpu.dot_dimension_numbers<[1], [0], [0], [1], [0, 0, 1, 1], [], []>} : vector<2x48xf32>, vector<48x24xf32>, vector<2x24xf32> -> vector<2x24xf32>
    %197 = arith.addf %190, %196 : vector<2x24xf32>
    %c0_163 = arith.constant 0 : index
    %c0_164 = arith.constant 0 : index
    %198 = vector.load %arg23[%c0_163, %c0_164] : memref<1x24xf32, #tpu.memory_space<vmem>>, vector<1x24xf32>
    %199 = vector.broadcast %198 : vector<1x24xf32> to vector<2x24xf32>
    %200 = arith.addf %197, %199 : vector<2x24xf32>
    %cst_165 = arith.constant 0.000000e+00 : f32
    %201 = vector.broadcast %cst_165 : f32 to vector<2x24xf32>
    %202 = arith.maximumf %200, %201 : vector<2x24xf32>
    %cst_166 = arith.constant dense<0.000000e+00> : vector<24xf32>
    %203 = vector.multi_reduction <add>, %202, %cst_166 [0] : vector<2x24xf32> to vector<24xf32>
    %204 = vector.shape_cast %203 : vector<24xf32> to vector<1x24xf32>
    %cst_167 = arith.constant 2.000000e+00 : f32
    %205 = vector.broadcast %cst_167 : f32 to vector<1x24xf32>
    %206 = arith.divf %204, %205 : vector<1x24xf32>
    %207 = arith.mulf %202, %202 : vector<2x24xf32>
    %cst_168 = arith.constant dense<0.000000e+00> : vector<24xf32>
    %208 = vector.multi_reduction <add>, %207, %cst_168 [0] : vector<2x24xf32> to vector<24xf32>
    %209 = vector.shape_cast %208 : vector<24xf32> to vector<1x24xf32>
    %cst_169 = arith.constant 2.000000e+00 : f32
    %210 = vector.broadcast %cst_169 : f32 to vector<1x24xf32>
    %211 = arith.divf %209, %210 : vector<1x24xf32>
    %c0_170 = arith.constant 0 : index
    %c0_171 = arith.constant 0 : index
    %212 = vector.load %arg21[%c0_170, %c0_171] : memref<24x24xf32, #tpu.memory_space<vmem>>, vector<24x24xf32>
    %cst_172 = arith.constant dense<0.000000e+00> : vector<1x24xf32>
    %213 = tpu.matmul %206, %212, %cst_172 {dimension_numbers = #tpu.dot_dimension_numbers<[1], [0], [0], [1], [0, 0, 1, 1], [], []>} : vector<1x24xf32>, vector<24x24xf32>, vector<1x24xf32> -> vector<1x24xf32>
    %c0_173 = arith.constant 0 : index
    %c0_174 = arith.constant 0 : index
    %214 = vector.load %arg21[%c0_173, %c0_174] : memref<24x24xf32, #tpu.memory_space<vmem>>, vector<24x24xf32>
    %cst_175 = arith.constant dense<0.000000e+00> : vector<1x24xf32>
    %215 = tpu.matmul %211, %214, %cst_175 {dimension_numbers = #tpu.dot_dimension_numbers<[1], [0], [0], [1], [0, 0, 1, 1], [], []>} : vector<1x24xf32>, vector<24x24xf32>, vector<1x24xf32> -> vector<1x24xf32>
    %216 = arith.mulf %213, %213 : vector<1x24xf32>
    %217 = arith.subf %215, %216 : vector<1x24xf32>
    %cst_176 = arith.constant 0.000000e+00 : f32
    %218 = vector.broadcast %cst_176 : f32 to vector<1x24xf32>
    %219 = arith.maximumf %217, %218 : vector<1x24xf32>
    %c0_177 = arith.constant 0 : index
    %c0_178 = arith.constant 0 : index
    %220 = vector.load %arg24[%c0_177, %c0_178] : memref<2x24xf32, #tpu.memory_space<vmem>>, vector<2x24xf32>
    %221 = vector.extract_strided_slice %220 {offsets = [0, 0], sizes = [1, 24], strides = [1, 1]} : vector<2x24xf32> to vector<1x24xf32>
    %cst_179 = arith.constant 9.99999974E-6 : f32
    %222 = vector.broadcast %cst_179 : f32 to vector<1x24xf32>
    %223 = arith.addf %219, %222 : vector<1x24xf32>
    %224 = math.rsqrt %223 : vector<1x24xf32>
    %225 = arith.mulf %221, %224 : vector<1x24xf32>
    %226 = vector.extract_strided_slice %220 {offsets = [1, 0], sizes = [1, 24], strides = [1, 1]} : vector<2x24xf32> to vector<1x24xf32>
    %227 = arith.mulf %213, %225 : vector<1x24xf32>
    %228 = arith.subf %226, %227 : vector<1x24xf32>
    %c0_180 = arith.constant 0 : index
    %c0_181 = arith.constant 0 : index
    %229 = vector.load %arg22[%c0_180, %c0_181] : memref<24x24xf32, #tpu.memory_space<vmem>>, vector<24x24xf32>
    %cst_182 = arith.constant dense<0.000000e+00> : vector<1x24xf32>
    %230 = tpu.matmul %225, %229, %cst_182 {dimension_numbers = #tpu.dot_dimension_numbers<[1], [0], [0], [1], [0, 0, 1, 1], [], []>} : vector<1x24xf32>, vector<24x24xf32>, vector<1x24xf32> -> vector<1x24xf32>
    %c0_183 = arith.constant 0 : index
    %c0_184 = arith.constant 0 : index
    %231 = vector.load %arg22[%c0_183, %c0_184] : memref<24x24xf32, #tpu.memory_space<vmem>>, vector<24x24xf32>
    %cst_185 = arith.constant dense<0.000000e+00> : vector<1x24xf32>
    %232 = tpu.matmul %228, %231, %cst_185 {dimension_numbers = #tpu.dot_dimension_numbers<[1], [0], [0], [1], [0, 0, 1, 1], [], []>} : vector<1x24xf32>, vector<24x24xf32>, vector<1x24xf32> -> vector<1x24xf32>
    %233 = vector.broadcast %230 : vector<1x24xf32> to vector<2x24xf32>
    %234 = arith.mulf %202, %233 : vector<2x24xf32>
    %235 = vector.broadcast %232 : vector<1x24xf32> to vector<2x24xf32>
    %236 = arith.addf %234, %235 : vector<2x24xf32>
    %c0_186 = arith.constant 0 : index
    %c0_187 = arith.constant 0 : index
    %237 = vector.load %arg25[%c0_186, %c0_187] : memref<2x24xf32, #tpu.memory_space<vmem>>, vector<2x24xf32>
    tpu.vector_store %arg25[%c0_186, %c0_187], %236 {strides = array<i32>} : memref<2x24xf32, #tpu.memory_space<vmem>>, vector<2x24xf32>,
    return
  }
}

</mosaic_0001>

<bundles_post_ra>
// kernel: _lambda_.1
= control target key start
LH: loop header
LB: loop body
LE: loop exit
PB: predicated region body
PF: predicated region fallthrough
CT: control target
= control target key end

     0   :  { %s5694_s0 = inlined_call_operand.vmem [shape: f32[32,48], index: 0, kind: input, shape index: {}]   ;;  %s5695_s1 = inlined_call_operand.hbm [shape: f32[3,48,192], index: 1, kind: input, shape index: {}]   ;;  %s5696_s2 = inlined_call_operand.hbm [shape: f32[3,16,32], index: 2, kind: input, shape index: {}]   ;;  %s5697_s3 = inlined_call_operand.hbm [shape: f32[192,24], index: 3, kind: input, shape index: {}]   ;;  %s5698_s4 = inlined_call_operand.hbm [shape: f32[24,192], index: 4, kind: input, shape index: {}]   ;;  %s5699_s5 = inlined_call_operand.vmem [shape: f32[1,192], index: 5, kind: input, shape index: {}]   ;;  %s5700_s6 = inlined_call_operand.vmem [shape: f32[2,24], index: 6, kind: input, shape index: {}, may-alias: {6,12,18,24}]   ;;  %s5701_s7 = inlined_call_operand.hbm [shape: f32[3,192,96], index: 7, kind: input, shape index: {}]   ;;  %s5702_s8 = inlined_call_operand.hbm [shape: f32[3,8,16], index: 8, kind: input, shape index: {}]   ;;  %s5703_s9 = inlined_call_operand.hbm [shape: f32[96,24], index: 9, kind: input, shape index: {}]   ;;  %s5704_s10 = inlined_call_operand.hbm [shape: f32[24,96], index: 10, kind: input, shape index: {}]   ;;  %s5705_s11 = inlined_call_operand.hbm [shape: f32[1,96], index: 11, kind: input, shape index: {}]   ;;  %s5706_s12 = inlined_call_operand.vmem [shape: f32[2,24], index: 12, kind: input, shape index: {}, may-alias: {6,12,18,24}]   ;;  %s5707_s13 = inlined_call_operand.vmem [shape: f32[3,96,48], index: 13, kind: input, shape index: {}]   ;;  %s5708_s14 = inlined_call_operand.hbm [shape: f32[3,4,8], index: 14, kind: input, shape index: {}]   ;;  %s5709_s15 = inlined_call_operand.hbm [shape: f32[48,24], index: 15, kind: input, shape index: {}]   ;;  %s5710_s16 = inlined_call_operand.hbm [shape: f32[24,48], index: 16, kind: input, shape index: {}]   ;;  %s5711_s17 = inlined_call_operand.hbm [shape: f32[1,48], index: 17, kind: input, shape index: {}]   ;;  %s5712_s18 = inlined_call_operand.vmem [shape: f32[2,24], index: 18, kind: input, shape index: {}, may-alias: {6,12,18,24}]   ;;  %s5713_s19 = inlined_call_operand.vmem [shape: f32[3,48,24], index: 19, kind: input, shape index: {}]   ;;  %s5714_s20 = inlined_call_operand.vmem [shape: f32[3,2,4], index: 20, kind: input, shape index: {}]   ;;  %s5715_s21 = inlined_call_operand.hbm [shape: f32[24,24], index: 21, kind: input, shape index: {}, may-alias: {21,22}]   ;;  %s5716_s22 = inlined_call_operand.hbm [shape: f32[24,24], index: 22, kind: input, shape index: {}, may-alias: {21,22}]   ;;  %s5717_s23 = inlined_call_operand.vmem [shape: f32[1,24], index: 23, kind: input, shape index: {}]   ;;  %s5718_s24 = inlined_call_operand.vmem [shape: f32[2,24], index: 24, kind: input, shape index: {}, may-alias: {6,12,18,24}]   ;;  %s5719_s25 = inlined_call_operand.hbm [shape: f32[2,24], index: 25, kind: output, shape index: {}]  }
   0x1   :  { %5722 = sst [smem:[#allocation36_spill]] %s5694_s0 }
   0x2   :  { %5723 = sst [smem:[#allocation37_spill]] %s5695_s1 }
   0x3   :  { %5724 = sst [smem:[#allocation38_spill]] %s5696_s2 }
   0x4   :  { %5725 = sst [smem:[#allocation39_spill]] %s5697_s3 }
   0x5   :  { %5726 = sst [smem:[#allocation40_spill]] %s5698_s4 }
   0x6   :  { %5727 = sst [smem:[#allocation41_spill]] %s5699_s5 }
   0x7   :  { %5728 = sst [smem:[#allocation42_spill]] %s5700_s6 }
   0x8   :  { %5729 = sst [smem:[#allocation43_spill]] %s5701_s7 }
   0x9   :  { %5730 = sst [smem:[#allocation44_spill]] %s5702_s8 }
   0xa   :  { %5731 = sst [smem:[#allocation45_spill]] %s5703_s9 }
   0xb   :  { %30 = vsyncpa [#allocation3], 0 }
   0xc   :  { %31 = vsyncpa [#allocation6], 0 }
   0xd   :  { %32 = vsyncpa [#allocation9], 0 }
   0xe   :  { %33 = vsyncpa [#allocation12], 0 }
   0xf   :  { %34 = vsyncpa [#allocation15], 0 }
  0x10   :  { %35 = vsyncpa [#allocation18], 0 }
  0x11   :  { %36 = vsyncpa [#allocation21], 0 }
  0x12   :  { %37 = vsyncpa [#allocation24], 0 }
  0x13   :  { %38 = vsyncpa [#allocation4], 0  ;;  %s4775_s29 = smov [#allocation5]  }
  0x14   :  { %s58_s2 = sshll.u32 %s4775_s29, 4  ;;  %s59_s2 = int_to_ptr.vmem [resolvable:$true] %s58_s2 }
  0x15   :  { %s4445_s6 = scalar_lea.vmem %s59_s2, 768  ;;  %p4450_p1 = scmp.lt.s32.totalorder %s59_s2, %s59_s2 }
  0x16   :  { %p4446_p0 = scmp.ne.s32.totalorder %s59_s2, %s4445_s6  ;;  %p4451_p2 = scmp.lt.s32.totalorder %s4445_s6, %s4445_s6 }
  0x18   :  { %p4452_p3 = por %p4451_p2, %p4450_p1 }
  0x1a   :  { %p4453_p4 = pnand %p4452_p3, %p4446_p0 }
  0x1c   :  { %4456 = shalt.err (!%p4453_p4)
}
  0x1d   :  { %s4776_s30 = smov 128   ;;  %s4777_s7 = smov 8  }
  0x1e   :  { %s5732_s1 = sld [smem:[#allocation38_spill]]  ;;  %s4778_s8 = smov [#allocation8]  }
  0x1f   :  { %s82_s27 = sshll.u32 %s4778_s8, 4  ;;  %s4779_s4 = smov [#allocation11]   ;;  %s83_s27 = int_to_ptr.vmem [resolvable:$true] %s82_s27 }
  0x20   :  { %s110_s28 = sshll.u32 %s4779_s4, 4  ;;  %s4465_s9 = scalar_lea.vmem %s83_s27, 768  ;;  %s111_s28 = int_to_ptr.vmem [resolvable:$true] %s110_s28 }
  0x21   :  { %p4466_p5 = scmp.ne.s32.totalorder %s83_s27, %s4465_s9  ;;  %p4470_p6 = scmp.lt.s32.totalorder %s83_s27, %s83_s27 }
  0x22   :  { %p4471_p7 = scmp.lt.s32.totalorder %s4465_s9, %s4465_s9 }
  0x24   :  { %64 = dma.hbm_to_vmem [thread:$0]  %s5732_s1, 768, %s59_s2, [#allocation6], %s4776_s30, %s4776_s30, %s4777_s7  }
  0x25   :  { %p4472_p8 = por %p4471_p7, %p4470_p6 }
  0x27   :  { %p4473_p9 = pnand %p4472_p8, %p4466_p5 }
  0x29   :  { %4476 = shalt.err (!%p4473_p9)
}
  0x2a   :  { %s5721_s5 = smov 256   ;;  %s4781_s0 = smov 16  }
  0x2b   :  { %s5733_s2 = sld [smem:[#allocation40_spill]]  ;;  %s4485_s3 = scalar_lea.vmem %s111_s28, 384 }
  0x2c   :  { %p4486_p10 = scmp.ne.s32.totalorder %s111_s28, %s4485_s3  ;;  %p4490_p11 = scmp.lt.s32.totalorder %s111_s28, %s111_s28 }
  0x2d   :  { %p4491_p12 = scmp.lt.s32.totalorder %s4485_s3, %s4485_s3 }
  0x2f   :  { %p4492_p13 = por %p4491_p12, %p4490_p11 }
  0x31   :  { %88 = dma.hbm_to_vmem [thread:$0]  %s5733_s2, 768, %s83_s27, [#allocation9], %s5721_s5, %s5721_s5, %s4781_s0  }
  0x32   :  { %p4493_p0 = pnand %p4492_p13, %p4486_p10 }
  0x34   :  { %4496 = shalt.err (!%p4493_p0)
}
  0x35   :  { %s5734_s8 = sld [smem:[#allocation44_spill]]  ;;  %s4782_s4 = smov [#allocation14]  }
  0x36   :  { %s134_s9 = sshll.u32 %s4782_s4, 4  ;;  %s4783_s29 = smov [#allocation17]   ;;  %s135_s9 = int_to_ptr.vmem [resolvable:$true] %s134_s9 }
  0x37   :  { %s160_s27 = sshll.u32 %s4783_s29, 4  ;;  %s4505_s6 = scalar_lea.vmem %s135_s9, 384  ;;  %s161_s27 = int_to_ptr.vmem [resolvable:$true] %s160_s27 }
  0x38   :  { %p4506_p1 = scmp.ne.s32.totalorder %s135_s9, %s4505_s6  ;;  %p4510_p2 = scmp.lt.s32.totalorder %s135_s9, %s135_s9 }
  0x39   :  { %p4511_p3 = scmp.lt.s32.totalorder %s4505_s6, %s4505_s6 }
  0x3b   :  { %116 = dma.hbm_to_vmem [thread:$0]  %s5734_s8, 384, %s111_s28, [#allocation12], %s4776_s30, %s4776_s30, %s4777_s7  }
  0x3c   :  { %p4512_p4 = por %p4511_p3, %p4510_p2 }
  0x3e   :  { %p4513_p5 = pnand %p4512_p4, %p4506_p1 }
  0x40   :  { %4516 = shalt.err (!%p4513_p5)
}
  0x41   :  { %140 = dma.hbm_to_vmem [thread:$0]  %s5704_s10, 384, %s135_s9, [#allocation15], %s4776_s30, %s4776_s30, %s4777_s7  }
  0x42   :  { %s4525_s28 = scalar_lea.vmem %s161_s27, 192  ;;  %p4530_p7 = scmp.lt.s32.totalorder %s161_s27, %s161_s27 }
  0x43   :  { %p4526_p6 = scmp.ne.s32.totalorder %s161_s27, %s4525_s28  ;;  %p4531_p8 = scmp.lt.s32.totalorder %s4525_s28, %s4525_s28 }
  0x45   :  { %p4532_p9 = por %p4531_p8, %p4530_p7 }
  0x47   :  { %p4533_p10 = pnand %p4532_p9, %p4526_p6 }
  0x49   :  { %4536 = shalt.err (!%p4533_p10)
}
  0x4a   :  { %s4784_s26 = smov 64   ;;  %s4785_s1 = smov 4  }
  0x4b   :  { %166 = dma.hbm_to_vmem [thread:$0]  %s5708_s14, 192, %s161_s27, [#allocation18], %s4784_s26, %s4784_s26, %s4785_s1  }
  0x4c   :  { %s4786_s29 = smov [#allocation20]   ;;  %s4787_s5 = smov [#allocation23]  }
  0x4d   :  { %s184_s6 = sshll.u32 %s4786_s29, 4  ;;  %s212_s2 = sshll.u32 %s4787_s5, 4  ;;  %s185_s6 = int_to_ptr.vmem [resolvable:$true] %s184_s6  ;;  %s213_s2 = int_to_ptr.vmem [resolvable:$true] %s212_s2 }
  0x4e   :  { %s4545_s10 = scalar_lea.vmem %s185_s6, 384  ;;  %p4550_p12 = scmp.lt.s32.totalorder %s185_s6, %s185_s6 }
  0x4f   :  { %p4546_p11 = scmp.ne.s32.totalorder %s185_s6, %s4545_s10  ;;  %p4551_p13 = scmp.lt.s32.totalorder %s4545_s10, %s4545_s10 }
  0x51   :  { %p4552_p0 = por %p4551_p13, %p4550_p12 }
  0x53   :  { %p4553_p1 = pnand %p4552_p0, %p4546_p11 }
  0x55   :  { %4556 = shalt.err (!%p4553_p1)
}
  0x56   :  { %190 = dma.hbm_to_vmem [thread:$0]  %s5710_s16, 384, %s185_s6, [#allocation21], %s4776_s30, %s4776_s30, %s4777_s7  }
  0x57   :  { %s4565_s14 = scalar_lea.vmem %s213_s2, 384  ;;  %p4570_p3 = scmp.lt.s32.totalorder %s213_s2, %s213_s2 }
  0x58   :  { %p4566_p2 = scmp.ne.s32.totalorder %s213_s2, %s4565_s14  ;;  %p4571_p4 = scmp.lt.s32.totalorder %s4565_s14, %s4565_s14 }
  0x5a   :  { %p4572_p5 = por %p4571_p4, %p4570_p3 }
  0x5c   :  { %p4573_p6 = pnand %p4572_p5, %p4566_p2 }
  0x5e   :  { %4576 = shalt.err (!%p4573_p6)
}
  0x5f   :  { %218 = dma.hbm_to_vmem [thread:$0]  %s5715_s21, 384, %s213_s2, [#allocation24], %s4776_s30, %s4776_s30, %s4777_s7  }
  0x60   :  { %s4788_s28 = smov [#allocation2]   ;;  %s4789_s1 = smov [#allocation7]  }
  0x61   :  { %s46_s26 = sshll.u32 %s4788_s28, 4  ;;  %s70_s16 = sshll.u32 %s4789_s1, 4  ;;  %s47_s26 = int_to_ptr.vmem [resolvable:$true] %s46_s26  ;;  %s71_s16 = int_to_ptr.vmem [resolvable:$true] %s70_s16 }
  0x62   :  { %s4585_s8 = scalar_lea.vmem %s47_s26, 4608  ;;  %p4590_p8 = scmp.lt.s32.totalorder %s47_s26, %s47_s26 }
  0x63   :  { %p4586_p7 = scmp.ne.s32.totalorder %s47_s26, %s4585_s8  ;;  %p4591_p9 = scmp.lt.s32.totalorder %s4585_s8, %s4585_s8 }
  0x65   :  { %p4592_p10 = por %p4591_p9, %p4590_p8 }
  0x67   :  { %p4593_p11 = pnand %p4592_p10, %p4586_p7 }
  0x69   :  { %4596 = shalt.err (!%p4593_p11)
}
  0x6a   :  { %s5735_s4 = smov 256   ;;  %s5736_s10 = sld [smem:[#allocation37_spill]] }
  0x6b   :  { %s4605_s21 = scalar_lea.vmem %s71_s16, 3072  ;;  %p4610_p13 = scmp.lt.s32.totalorder %s71_s16, %s71_s16 }
  0x6c   :  { %p4606_p12 = scmp.ne.s32.totalorder %s71_s16, %s4605_s21  ;;  %p4611_p0 = scmp.lt.s32.totalorder %s4605_s21, %s4605_s21 }
  0x6e   :  { %p4612_p1 = por %p4611_p0, %p4610_p13 }
  0x70   :  { %52 = dma.hbm_to_vmem [thread:$0]  %s5736_s10, 4608, %s47_s26, [#allocation3], %s5735_s4, %s5735_s4, %s4781_s0  }
  0x71   :  { %p4613_p2 = pnand %p4612_p1, %p4606_p12 }
  0x73   :  { %4616 = shalt.err (!%p4613_p2)
}
  0x74   :  { %s5737_s3 = sld [smem:[#allocation39_spill]]  ;;  %s4790_s14 = smov [#allocation10]  }
  0x75   :  { %s98_s5 = sshll.u32 %s4790_s14, 4  ;;  %s4791_s27 = smov [#allocation13]   ;;  %s99_s5 = int_to_ptr.vmem [resolvable:$true] %s98_s5 }
  0x76   :  { %s122_s0 = sshll.u32 %s4791_s27, 4  ;;  %s4625_s28 = scalar_lea.vmem %s99_s5, 9216  ;;  %s123_s0 = int_to_ptr.vmem [resolvable:$true] %s122_s0 }
  0x77   :  { %p4626_p3 = scmp.ne.s32.totalorder %s99_s5, %s4625_s28  ;;  %p4630_p4 = scmp.lt.s32.totalorder %s99_s5, %s99_s5 }
  0x78   :  { %p4631_p5 = scmp.lt.s32.totalorder %s4625_s28, %s4625_s28 }
  0x7a   :  { %76 = dma.hbm_to_vmem [thread:$0]  %s5737_s3, 3072, %s71_s16, [#allocation6], %s4776_s30, %s4776_s30, %s4777_s7  }
  0x7b   :  { %p4632_p6 = por %p4631_p5, %p4630_p4 }
  0x7d   :  { %p4633_p7 = pnand %p4632_p6, %p4626_p3 }
  0x7f   :  { %4636 = shalt.err (!%p4633_p7)
}
  0x80   :  { %s5738_s8 = sld [smem:[#allocation43_spill]]  ;;  %s4645_s16 = scalar_lea.vmem %s123_s0, 1536 }
  0x81   :  { %p4646_p8 = scmp.ne.s32.totalorder %s123_s0, %s4645_s16  ;;  %p4650_p9 = scmp.lt.s32.totalorder %s123_s0, %s123_s0 }
  0x82   :  { %p4651_p10 = scmp.lt.s32.totalorder %s4645_s16, %s4645_s16 }
  0x84   :  { %p4652_p11 = por %p4651_p10, %p4650_p9 }
  0x86   :  { %104 = dma.hbm_to_vmem [thread:$0]  %s5738_s8, 9216, %s99_s5, [#allocation9], %s4776_s30, %s4776_s30, %s4777_s7  }
  0x87   :  { %p4653_p12 = pnand %p4652_p11, %p4646_p8 }
  0x89   :  { %4656 = shalt.err (!%p4653_p12)
}
  0x8a   :  { %s5739_s6 = sld [smem:[#allocation45_spill]]  ;;  %s4792_s10 = smov [#allocation16]  }
  0x8b   :  { %s147_s21 = sshll.u32 %s4792_s10, 4  ;;  %s4793_s2 = smov [#allocation19]   ;;  %s148_s21 = int_to_ptr.vmem [resolvable:$true] %s147_s21 }
  0x8c   :  { %s172_s9 = sshll.u32 %s4793_s2, 4  ;;  %s4665_s3 = scalar_lea.vmem %s148_s21, 16  ;;  %s173_s9 = int_to_ptr.vmem [resolvable:$true] %s172_s9 }
  0x8d   :  { %p4666_p13 = scmp.ne.s32.totalorder %s148_s21, %s4665_s3  ;;  %s4669_s14 = scalar_lea.vmem %s148_s21, 32 }
  0x8e   :  { %p4670_p0 = scmp.lt.s32.totalorder %s148_s21, %s148_s21  ;;  %p4671_p1 = scmp.lt.s32.totalorder %s4669_s14, %s4665_s3 }
  0x90   :  { %128 = dma.hbm_to_vmem [thread:$0]  %s5739_s6, 1536, %s123_s0, [#allocation12], %s4776_s30, %s4776_s30, %s4777_s7  }
  0x91   :  { %p4672_p2 = por %p4671_p1, %p4670_p0 }
  0x93   :  { %p4673_p3 = pnand %p4672_p2, %p4666_p13 }
  0x95   :  { %4676 = shalt.err (!%p4673_p3)
}
  0x96   :  { %150 = dma.hbm_to_vmem [thread:$0]  %s5705_s11, 16, %s148_s21, [#allocation15]  }
  0x97   :  { %s4685_s28 = scalar_lea.vmem %s173_s9, 768  ;;  %p4690_p5 = scmp.lt.s32.totalorder %s173_s9, %s173_s9 }
  0x98   :  { %p4686_p4 = scmp.ne.s32.totalorder %s173_s9, %s4685_s28  ;;  %p4691_p6 = scmp.lt.s32.totalorder %s4685_s28, %s4685_s28 }
  0x9a   :  { %p4692_p7 = por %p4691_p6, %p4690_p5 }
  0x9c   :  { %p4693_p8 = pnand %p4692_p7, %p4686_p4 }
  0x9e   :  { %4696 = shalt.err (!%p4693_p8)
}
  0x9f   :  { %178 = dma.hbm_to_vmem [thread:$0]  %s5709_s15, 768, %s173_s9, [#allocation18], %s4776_s30, %s4776_s30, %s4777_s7  }
  0xa0   :  { %s4794_s1 = smov [#allocation22]   ;;  %s4795_s16 = smov [#allocation25]  }
  0xa1   :  { %s197_s8 = sshll.u32 %s4794_s1, 4  ;;  %s224_s11 = sshll.u32 %s4795_s16, 4  ;;  %s198_s8 = int_to_ptr.vmem [resolvable:$true] %s197_s8  ;;  %s225_s11 = int_to_ptr.vmem [resolvable:$true] %s224_s11 }
  0xa2   :  { %s4705_s4 = scalar_lea.vmem %s198_s8, 16  ;;  %s4709_s29 = scalar_lea.vmem %s198_s8, 32 }
  0xa3   :  { %p4706_p9 = scmp.ne.s32.totalorder %s198_s8, %s4705_s4  ;;  %p4710_p10 = scmp.lt.s32.totalorder %s198_s8, %s198_s8 }
  0xa4   :  { %p4711_p11 = scmp.lt.s32.totalorder %s4709_s29, %s4705_s4 }
  0xa6   :  { %p4712_p12 = por %p4711_p11, %p4710_p10 }
  0xa8   :  { %p4713_p13 = pnand %p4712_p12, %p4706_p9 }
  0xaa   :  { %4716 = shalt.err (!%p4713_p13)
}
  0xab   :  { %200 = dma.hbm_to_vmem [thread:$0]  %s5711_s17, 16, %s198_s8, [#allocation21]  }
  0xac   :  { %s4725_s21 = scalar_lea.vmem %s225_s11, 384  ;;  %p4730_p1 = scmp.lt.s32.totalorder %s225_s11, %s225_s11 }
  0xad   :  { %p4726_p0 = scmp.ne.s32.totalorder %s225_s11, %s4725_s21  ;;  %p4731_p2 = scmp.lt.s32.totalorder %s4725_s21, %s4725_s21 }
  0xaf   :  { %p4732_p3 = por %p4731_p2, %p4730_p1 }
  0xb1   :  { %p4733_p4 = pnand %p4732_p3, %p4726_p0 }
  0xb3   :  { %4736 = shalt.err (!%p4733_p4)
}
  0xb4   :  { %230 = dma.hbm_to_vmem [thread:$0]  %s5716_s22, 384, %s225_s11, [#allocation24], %s4776_s30, %s4776_s30, %s4777_s7  }
  0xb5   :  { %4757 = dma.done.wait [#allocation3], 4608  }
  0xb6   :  { %4758 = vsyncadd [#allocation3], 4294962688 }
  0xb7   :  { %4759 = dma.done.wait [#allocation6], 3840  }
  0xb8   :  { %4760 = vsyncadd [#allocation6], 4294963456 }
  0xb9   :  { %4761 = dma.done.wait [#allocation9], 9984  }
  0xba   :  { %4762 = vsyncadd [#allocation9], 4294957312 }
  0xbb   :  { %4763 = dma.done.wait [#allocation12], 1920  }
  0xbc   :  { %4764 = vsyncadd [#allocation12], 4294965376 }
  0xbd   :  { %4765 = dma.done.wait [#allocation15], 400  }
  0xbe   :  { %4766 = vsyncadd [#allocation15], 4294966896 }
  0xbf   :  { %4767 = dma.done.wait [#allocation18], 960  }
  0xc0   :  { %4768 = vsyncadd [#allocation18], 4294966336 }
  0xc1   :  { %4769 = dma.done.wait [#allocation21], 400  }
  0xc2   :  { %4770 = vsyncadd [#allocation21], 4294966896 }
  0xc3   :  { %4771 = dma.done.wait [#allocation24], 768  }
  0xc4   :  { %4772 = vsyncadd [#allocation24], 4294966528  ;;  %s5740_s3 = sld [smem:[#allocation36_spill]]  ;;  %v284_v4 = vld [vmem:[#allocation5] sm:$0xff]  ;;  %vm286_vm0 = vcmask 261120   ;;  %v381_v5 = vld [vmem:[#allocation5 + $0x10] sm:$0xff] }
  0xc5   :  { %v285_v6 = vld [vmem:[#allocation5 + $0x8] sm:$0xff]  ;;  %v382_v7 = vld [vmem:[#allocation5 + $0x18] sm:$0xff]  ;;  %4068 = vmatprep.mubr.msk.f32.mxu0 %vm286_vm0, %v284_v4  ;;  %4079 = vmatprep.mubr.msk.f32.mxu1 %vm286_vm0, %v381_v5  ;;  %v475_v10 = vld [vmem:[#allocation2 + $0xb0] sm:$0xff]  ;;  %v4796_v32 = vmov 0.0   ;;  %vm477_vm1 = vcmask 392192   ;;  %s5741_s26 = sld [smem:[#allocation41_spill]] }
  0xc6   :  { %v476_v8 = vld [vmem:[#allocation2 + $0xb8] sm:$0xff]  ;;  %v378_v11 = vld [vmem:[#allocation2 + $0x50] sm:$0xff]  ;;  %v474_v12 = vld [vmem:[#allocation2 + $0xa8] sm:$0xff]  ;;  %vm855_vm2 = vcmask 523264   ;;  %s5742_s16 = sld [smem:[#allocation42_spill]]  ;;  %vm1078_vm3 = vcmask 195584  }
  0xc7   :  { %v379_v9 = vld [vmem:[#allocation2 + $0x58] sm:$0xff]  ;;  %v377_v13 = vld [vmem:[#allocation2 + $0x48] sm:$0xff]  ;;  %v473_v14 = vld [vmem:[#allocation2 + $0xa0] sm:$0xff]  ;;  %vm1253_vm4 = vcmask 130048   ;;  %vm4797_vm5 = vmmov 0   ;;  %vm1783_vm6 = vcmask 785408  }
  0xc8   :  { %v376_v15 = vld [vmem:[#allocation2 + $0x40] sm:$0xff]  ;;  %v472_v16 = vld [vmem:[#allocation2 + $0x98] sm:$0xff]  ;;  %v471_v18 = vld [vmem:[#allocation2 + $0x90] sm:$0xff]  ;;  %vm2133_vm7 = vcmask 64512   ;;  %vm2624_vm8 = vcmask 388096   ;;  %vm2972_vm9 = vcmask 1043456  }
  0xc9   :  { %v375_v17 = vld [vmem:[#allocation2 + $0x38] sm:$0xff]  ;;  %v374_v19 = vld [vmem:[#allocation2 + $0x30] sm:$0xff]  ;;  %v470_v20 = vld [vmem:[#allocation2 + $0x88] sm:$0xff]  ;;  %vm2968_vm10 = vcmask 31744   ;;  %vm3445_vm11 = vcmask 189440   ;;  %s4798_s0 = smov [#allocation26]  }
  0xca   :  { %v5013_v0 = vld [vmem:[%s5740_s3 + $0x18] sm:$0xff]  ;;  %v5018_v1 = vld [vmem:[%s5740_s3 + $0x10] sm:$0xff]  ;;  %v5027_v2 = vld [vmem:[%s5740_s3 + $0x8] sm:$0xff] }
  0xcb   :  { %4060 = vmatprep.subr.mxu0 %v5013_v0  ;;  %4071 = vmatprep.subr.mxu1 %v5013_v0  ;;  %v5036_v3 = vld [vmem:[%s5740_s3] sm:$0xff]  ;;  %v373_v21 = vld [vmem:[#allocation2 + $0x28] sm:$0xff]  ;;  %v468_v24 = vld [vmem:[#allocation2 + $0x78] sm:$0xff] }
  0xcc   :  { %4061 = vmatpush3.msra.mxu0 %v5013_v0  ;;  %4072 = vmatpush3.msra.mxu1 %v5013_v0  ;;  %v469_v22 = vld [vmem:[#allocation2 + $0x80] sm:$0xff]  ;;  %v371_v25 = vld [vmem:[#allocation2 + $0x18] sm:$0xff]  ;;  %v467_v26 = vld [vmem:[#allocation2 + $0x70] sm:$0xff] }
  0xcd   :  { %4062 = vmatprep.subr.mxu0 %v5018_v1  ;;  %4073 = vmatprep.subr.mxu1 %v5018_v1  ;;  %v372_v23 = vld [vmem:[#allocation2 + $0x20] sm:$0xff]  ;;  %v370_v27 = vld [vmem:[#allocation2 + $0x10] sm:$0xff]  ;;  %v466_v28 = vld [vmem:[#allocation2 + $0x68] sm:$0xff] }
  0xce   :  { %4063 = vmatpush3.msra.mxu0 %v5018_v1  ;;  %4074 = vmatpush3.msra.mxu1 %v5018_v1  ;;  %v369_v29 = vld [vmem:[#allocation2 + $0x8] sm:$0xff]  ;;  %v465_v30 = vld [vmem:[#allocation2 + $0x60] sm:$0xff]  ;;  %v740_v33 = vld [vmem:[#allocation2 + $0x118] sm:$0xff] }
  0xcf   :  { %4064 = vmatprep.subr.mxu0 %v5027_v2  ;;  %4075 = vmatprep.subr.mxu1 %v5027_v2  ;;  %v368_v31 = vld [vmem:[#allocation2] sm:$0xff]  ;;  %v646_v39 = vld [vmem:[#allocation5 + $0x28] sm:$0xff]  ;;  %v739_v40 = vld [vmem:[#allocation2 + $0x110] sm:$0xff] }
  0xd0   :  { %4065 = vmatpush3.msra.mxu0 %v5027_v2  ;;  %4076 = vmatpush3.msra.mxu1 %v5027_v2  ;;  %v645_v38 = vld [vmem:[#allocation5 + $0x20] sm:$0xff]  ;;  %v738_v41 = vld [vmem:[#allocation2 + $0x108] sm:$0xff]  ;;  %v736_v43 = vld [vmem:[#allocation2 + $0xf8] sm:$0xff] }
  0xd1   :  { %4066 = vmatprep.subr.mxu0 %v5036_v3  ;;  %4077 = vmatprep.subr.mxu1 %v5036_v3  ;;  %v737_v42 = vld [vmem:[#allocation2 + $0x100] sm:$0xff]  ;;  %v735_v44 = vld [vmem:[#allocation2 + $0xf0] sm:$0xff]  ;;  %v734_v45 = vld [vmem:[#allocation2 + $0xe8] sm:$0xff] }
  0xd2   :  { %4067 = vmatpush3.msra.mxu0 %v5036_v3  ;;  %4078 = vmatpush3.msra.mxu1 %v5036_v3  ;;  %v733_v46 = vld [vmem:[#allocation2 + $0xe0] sm:$0xff]  ;;  %v732_v47 = vld [vmem:[#allocation2 + $0xd8] sm:$0xff]  ;;  %v731_v48 = vld [vmem:[#allocation2 + $0xd0] sm:$0xff] }
  0xd3   :  { %4069 = vmatmul.mubr.msk.f32.vlgmr.msra.gmra.mxu0 %vm286_vm0, %v285_v6  ;;  %4080 = vmatmul.mubr.msk.f32.vlgmr.msra.gmra.mxu1 %vm286_vm0, %v382_v7  ;;  %v730_v49 = vld [vmem:[#allocation2 + $0xc8] sm:$0xff]  ;;  %v729_v50 = vld [vmem:[#allocation2 + $0xc0] sm:$0xff]  ;;  %v903_v53 = vld [vmem:[#allocation7 + $0x68] sm:$0xff] }
  0xd4   :  { %504 = vmatprep.subr.mxu0 %v476_v8  ;;  %587 = vmatprep.subr.mxu1 %v379_v9  ;;  %v905_v51 = vld [vmem:[#allocation7 + $0x78] sm:$0xff]  ;;  %v904_v52 = vld [vmem:[#allocation7 + $0x70] sm:$0xff]  ;;  %v902_v54 = vld [vmem:[#allocation7 + $0x60] sm:$0xff] }
  0xd5   :  { %505 = vmatpush1.msra.mxu0 %v475_v10  ;;  %588 = vmatpush1.msra.mxu1 %v378_v11  ;;  %v901_v55 = vld [vmem:[#allocation7 + $0x58] sm:$0xff]  ;;  %v900_v56 = vld [vmem:[#allocation7 + $0x50] sm:$0xff]  ;;  %v899_v57 = vld [vmem:[#allocation7 + $0x48] sm:$0xff] }
  0xd6   :  { %506 = vmatprep.subr.mxu0 %v474_v12  ;;  %589 = vmatprep.subr.mxu1 %v377_v13  ;;  %v898_v58 = vld [vmem:[#allocation7 + $0x40] sm:$0xff]  ;;  %v893_v5 = vld [vmem:[#allocation7 + $0x18] sm:$0xff]  ;;  %v892_v6 = vld [vmem:[#allocation7 + $0x10] sm:$0xff] }
  0xd7   :  { %507 = vmatpush1.msra.mxu0 %v473_v14  ;;  %590 = vmatpush1.msra.mxu1 %v376_v15  ;;  %v894_v4 = vld [vmem:[#allocation7 + $0x20] sm:$0xff]  ;;  %v891_v7 = vld [vmem:[#allocation7 + $0x8] sm:$0xff]  ;;  %v913_v9 = vld [vmem:[#allocation7 + $0xb8] sm:$0xff] }
  0xd8   :  { %508 = vmatprep.subr.mxu0 %v472_v16  ;;  %591 = vmatprep.subr.mxu1 %v375_v17  ;;  %v890_v8 = vld [vmem:[#allocation7] sm:$0xff]  ;;  %v912_v10 = vld [vmem:[#allocation7 + $0xb0] sm:$0xff]  ;;  %v911_v11 = vld [vmem:[#allocation7 + $0xa8] sm:$0xff] }
  0xd9   :  { %509 = vmatpush1.msra.mxu0 %v471_v18  ;;  %592 = vmatpush1.msra.mxu1 %v374_v19  ;;  %v910_v12 = vld [vmem:[#allocation7 + $0xa0] sm:$0xff]  ;;  %v909_v13 = vld [vmem:[#allocation7 + $0x98] sm:$0xff]  ;;  %v908_v14 = vld [vmem:[#allocation7 + $0x90] sm:$0xff]  ;;  %v830_v18 = vlaneseq }
  0xda   :  { %510 = vmatprep.subr.mxu0 %v470_v20  ;;  %593 = vmatprep.subr.mxu1 %v373_v21  ;;  %v907_v15 = vld [vmem:[#allocation7 + $0x88] sm:$0xff]  ;;  %v906_v16 = vld [vmem:[#allocation7 + $0x80] sm:$0xff] }
  0xdb   :  { %511 = vmatpush1.msra.mxu0 %v469_v22  ;;  %594 = vmatpush1.msra.mxu1 %v372_v23  ;;  %v831_v20 = vshrl.u32 %v830_v18, 7  ;;  %v828_v23 = vld [vmem:[%s5741_s26] sm:$0x3]  ;;  %s3792_s26 = sshll.u32 %s4798_s0, 4  ;;  %s3793_s26 = int_to_ptr.vmem [resolvable:$true] %s3792_s26 }
  0xdc   :  { %512 = vmatprep.subr.mxu0 %v468_v24  ;;  %595 = vmatprep.subr.mxu1 %v371_v25  ;;  %p4742_p6 = scmp.lt.s32.totalorder %s3793_s26, %s3793_s26 }
  0xdd   :  { %513 = vmatpush1.msra.mxu0 %v467_v26  ;;  %596 = vmatpush1.msra.mxu1 %v370_v27  ;;  %v5128_v22 = vsub.s32 0, %v831_v20  ;;  %v836_v24 = vsub.s32 1, %v831_v20 }
  0xde   :  { %514 = vmatprep.subr.mxu0 %v466_v28  ;;  %597 = vmatprep.subr.mxu1 %v369_v29 }
  0xdf   :  { %515 = vmatpush1.msra.mxu0 %v465_v30  ;;  %548 = vmatprep.mubr.f32.mxu0 %v4796_v32  ;;  %v833_v27 = vrot.slane %v828_v23, %v5128_v22 }
  0xe0   :  { %598 = vmatpush1.msra.mxu1 %v368_v31  ;;  %631 = vmatprep.mubr.f32.mxu1 %v4796_v32  ;;  %v837_v31 = vrot.slane %v828_v23, %v836_v24 }
  0xe1   :  { %4082 = vmatprep.subr.mxu0 %v5013_v0  ;;  %767 = vmatprep.subr.mxu1 %v740_v33 }
 0x193   :  { %v4070_v34 = vpop.f32.mrf.mxu0  ;;  %v4081_v35 = vpop.f32.mrf.mxu1 }
 0x195   :  { %v359_v36 = vpop.f32.mrf.mxu0  ;;  %v455_v37 = vpop.f32.mrf.mxu1 }
 0x196   :  { %3812 = vmatmul.mubr.msk.f32.vlgmr.msra.gmra.mxu0 %vm477_vm1, %v455_v37  ;;  %3814 = vmatmul.mubr.msk.f32.vlgmr.msra.gmra.mxu1 %vm477_vm1, %v359_v36 }
 0x197   :  { %4083 = vmatpush3.msra.mxu0 %v5013_v0  ;;  %554 = vmatprep.mubr.f32.mxu0 %v4796_v32 }
 0x198   :  { %4084 = vmatprep.subr.mxu0 %v5018_v1  ;;  %637 = vmatprep.mubr.f32.mxu1 %v4796_v32 }
 0x199   :  { %4085 = vmatpush3.msra.mxu0 %v5018_v1  ;;  %768 = vmatpush1.msra.mxu1 %v739_v40  ;;  %v897_v1 = vld [vmem:[#allocation7 + $0x38] sm:$0xff] }
 0x19a   :  { %3813 = vmatmul.mubr.msk.f32.gmra.mxu0 %vm477_vm1, %v4081_v35  ;;  %3815 = vmatmul.mubr.msk.f32.gmra.mxu1 %vm477_vm1, %v4070_v34 }
 0x19b   :  { %4086 = vmatprep.subr.mxu0 %v5027_v2  ;;  %4090 = vmatprep.mubr.msk.f32.mxu0 %vm286_vm0, %v645_v38 }
 0x19c   :  { %4087 = vmatpush3.msra.mxu0 %v5027_v2  ;;  %811 = vmatprep.mubr.f32.mxu1 %v4796_v32  ;;  %v896_v2 = vld [vmem:[#allocation7 + $0x30] sm:$0xff] }
 0x19d   :  { %4088 = vmatprep.subr.mxu0 %v5036_v3  ;;  %769 = vmatprep.subr.mxu1 %v738_v41 }
 0x19e   :  { %4089 = vmatpush3.msra.mxu0 %v5036_v3  ;;  %770 = vmatpush1.msra.mxu1 %v737_v42  ;;  %v895_v3 = vld [vmem:[#allocation7 + $0x28] sm:$0xff] }
 0x19f   :  { %4091 = vmatmul.mubr.msk.f32.vlgmr.msra.gmra.mxu0 %vm286_vm0, %v646_v39  ;;  %917 = vmatprep.subr.mxu0 %v4796_v32 }
 0x1a0   :  { %771 = vmatprep.subr.mxu1 %v736_v43  ;;  %918 = vmatpush1.msra.mxu0 %v905_v51 }
 0x1a1   :  { %772 = vmatpush1.msra.mxu1 %v735_v44  ;;  %919 = vmatprep.subr.mxu0 %v4796_v32 }
 0x1a2   :  { %773 = vmatprep.subr.mxu1 %v734_v45  ;;  %920 = vmatpush1.msra.mxu0 %v904_v52 }
 0x1a3   :  { %774 = vmatpush1.msra.mxu1 %v733_v46  ;;  %921 = vmatprep.subr.mxu0 %v4796_v32 }
 0x1a4   :  { %775 = vmatprep.subr.mxu1 %v732_v47  ;;  %922 = vmatpush1.msra.mxu0 %v903_v53 }
 0x1a5   :  { %776 = vmatpush1.msra.mxu1 %v731_v48  ;;  %923 = vmatprep.subr.mxu0 %v4796_v32 }
 0x1a6   :  { %777 = vmatprep.subr.mxu1 %v730_v49  ;;  %924 = vmatpush1.msra.mxu0 %v902_v54 }
 0x1a7   :  { %778 = vmatpush1.msra.mxu1 %v729_v50  ;;  %925 = vmatprep.subr.mxu0 %v4796_v32 }
 0x1a8   :  { %990 = vmatprep.subr.mxu1 %v4796_v32  ;;  %926 = vmatpush1.msra.mxu0 %v901_v55 }
 0x1a9   :  { %927 = vmatprep.subr.mxu0 %v4796_v32 }
 0x1aa   :  { %928 = vmatpush1.msra.mxu0 %v900_v56 }
 0x1ab   :  { %929 = vmatprep.subr.mxu0 %v4796_v32 }
 0x1ac   :  { %930 = vmatpush1.msra.mxu0 %v899_v57 }
 0x1ad   :  { %931 = vmatprep.subr.mxu0 %v4796_v32 }
 0x1ae   :  { %932 = vmatpush1.msra.mxu0 %v898_v58 }
 0x1af   :  { %933 = vmatprep.subr.mxu0 %v4796_v32 }
 0x1b0   :  { %934 = vmatpush1.msra.mxu0 %v897_v1 }
 0x1b1   :  { %935 = vmatprep.subr.mxu0 %v4796_v32 }
 0x1b2   :  { %936 = vmatpush1.msra.mxu0 %v896_v2 }
 0x1b3   :  { %937 = vmatprep.subr.mxu0 %v4796_v32 }
 0x1b4   :  { %938 = vmatpush1.msra.mxu0 %v895_v3 }
 0x1b5   :  { %939 = vmatprep.subr.mxu0 %v4796_v32 }
 0x1b6   :  { %940 = vmatpush1.msra.mxu0 %v894_v4 }
 0x1b7   :  { %941 = vmatprep.subr.mxu0 %v4796_v32 }
 0x1b8   :  { %942 = vmatpush1.msra.mxu0 %v893_v5 }
 0x1b9   :  { %943 = vmatprep.subr.mxu0 %v4796_v32 }
 0x1ba   :  { %944 = vmatpush1.msra.mxu0 %v892_v6 }
 0x1bb   :  { %945 = vmatprep.subr.mxu0 %v4796_v32 }
 0x1bc   :  { %946 = vmatpush1.msra.mxu0 %v891_v7 }
 0x1bd   :  { %947 = vmatprep.subr.mxu0 %v4796_v32 }
 0x1be   :  { %948 = vmatpush1.msra.mxu0 %v890_v8 }
 0x1bf   :  { %965 = vmatprep.subr.mxu0 %v4796_v32 }
 0x1c0   :  { %966 = vmatpush2.msra.mxu0 %v913_v9 }
 0x1c1   :  { %967 = vmatprep.subr.mxu0 %v4796_v32 }
 0x1c2   :  { %968 = vmatpush2.msra.mxu0 %v912_v10 }
 0x1c3   :  { %969 = vmatprep.subr.mxu0 %v4796_v32 }
 0x1c4   :  { %970 = vmatpush2.msra.mxu0 %v911_v11 }
 0x1c5   :  { %971 = vmatprep.subr.mxu0 %v4796_v32 }
 0x1c6   :  { %972 = vmatpush2.msra.mxu0 %v910_v12 }
 0x1c7   :  { %973 = vmatprep.subr.mxu0 %v4796_v32 }
 0x1c8   :  { %974 = vmatpush2.msra.mxu0 %v909_v13 }
 0x1c9   :  { %975 = vmatprep.subr.mxu0 %v4796_v32 }
 0x1ca   :  { %976 = vmatpush2.msra.mxu0 %v908_v14 }
 0x1cb   :  { %977 = vmatprep.subr.mxu0 %v4796_v32 }
 0x1cc   :  { %978 = vmatpush2.msra.mxu0 %v907_v15 }
 0x1cd   :  { %979 = vmatprep.subr.mxu0 %v4796_v32 }
 0x1ce   :  { %980 = vmatpush2.msra.mxu0 %v906_v16 }
 0x256   :  { %v5079_v59 = vpop.f32.mrf.mxu0  ;;  %v633_v17 = vpop.f32.mrf.mxu1 }
 0x257   :  { %v634_v26 = vadd.f32 %v633_v17, %v5079_v59 }
 0x258   :  { %v5081_v60 = vpop.f32.mrf.mxu0  ;;  %v635_v19 = vpop.f32.mrf.mxu1 }
 0x259   :  { %v636_v29 = vadd.f32 %v635_v19, %v5081_v60 }
 0x25a   :  { %v5083_v61 = vpop.f32.mrf.mxu0  ;;  %v639_v21 = vpop.f32.mrf.mxu1 }
 0x25b   :  { %v640_v34 = vadd.f32 %v639_v21, %v5083_v61 }
 0x25c   :  { %v5085_v62 = vpop.f32.mrf.mxu0  ;;  %v641_v25 = vpop.f32.mrf.mxu1 }
 0x25d   :  { %v642_v38 = vadd.f32 %v641_v25, %v5085_v62 }
 0x25f   :  { %v4092_v63 = vpop.f32.mrf.mxu0 }
 0x261   :  { %v719_v0 = vpop.f32.mrf.mxu0 }
 0x262   :  { %3818 = vmatmul.mubr.msk.f32.vlgmr.msra.gmra.mxu1 %vm477_vm1, %v719_v0 }
 0x263   :  { %817 = vmatprep.mubr.f32.mxu1 %v4796_v32  ;;  %991 = vmatpush1.msra.mxu1 %v905_v51 }
 0x264   :  { %992 = vmatprep.subr.mxu1 %v4796_v32 }
 0x265   :  { %993 = vmatpush1.msra.mxu1 %v904_v52 }
 0x266   :  { %3819 = vmatmul.mubr.msk.f32.gmra.mxu1 %vm477_vm1, %v4092_v63  ;;  %994 = vmatprep.subr.mxu1 %v4796_v32 }
 0x267   :  { %995 = vmatpush1.msra.mxu1 %v903_v53 }
 0x268   :  { %996 = vmatprep.subr.mxu1 %v4796_v32 }
 0x269   :  { %997 = vmatpush1.msra.mxu1 %v902_v54 }
 0x26a   :  { %998 = vmatprep.subr.mxu1 %v4796_v32 }
 0x26b   :  { %999 = vmatpush1.msra.mxu1 %v901_v55 }
 0x26c   :  { %1000 = vmatprep.subr.mxu1 %v4796_v32 }
 0x26d   :  { %1001 = vmatpush1.msra.mxu1 %v900_v56 }
 0x26e   :  { %1002 = vmatprep.subr.mxu1 %v4796_v32 }
 0x26f   :  { %1003 = vmatpush1.msra.mxu1 %v899_v57 }
 0x270   :  { %1004 = vmatprep.subr.mxu1 %v4796_v32 }
 0x271   :  { %1005 = vmatpush1.msra.mxu1 %v898_v58 }
 0x272   :  { %1006 = vmatprep.subr.mxu1 %v4796_v32 }
 0x273   :  { %1007 = vmatpush1.msra.mxu1 %v897_v1 }
 0x274   :  { %1008 = vmatprep.subr.mxu1 %v4796_v32 }
 0x275   :  { %1009 = vmatpush1.msra.mxu1 %v896_v2 }
 0x276   :  { %1010 = vmatprep.subr.mxu1 %v4796_v32 }
 0x277   :  { %1011 = vmatpush1.msra.mxu1 %v895_v3 }
 0x278   :  { %1012 = vmatprep.subr.mxu1 %v4796_v32 }
 0x279   :  { %1013 = vmatpush1.msra.mxu1 %v894_v4 }
 0x27a   :  { %1014 = vmatprep.subr.mxu1 %v4796_v32 }
 0x27b   :  { %1015 = vmatpush1.msra.mxu1 %v893_v5 }
 0x27c   :  { %1016 = vmatprep.subr.mxu1 %v4796_v32 }
 0x27d   :  { %1017 = vmatpush1.msra.mxu1 %v892_v6 }
 0x27e   :  { %1018 = vmatprep.subr.mxu1 %v4796_v32 }
 0x27f   :  { %1019 = vmatpush1.msra.mxu1 %v891_v7 }
 0x280   :  { %1020 = vmatprep.subr.mxu1 %v4796_v32 }
 0x281   :  { %1021 = vmatpush1.msra.mxu1 %v890_v8 }
 0x282   :  { %1038 = vmatprep.subr.mxu1 %v4796_v32 }
 0x283   :  { %1039 = vmatpush2.msra.mxu1 %v913_v9 }
 0x284   :  { %1040 = vmatprep.subr.mxu1 %v4796_v32 }
 0x285   :  { %1041 = vmatpush2.msra.mxu1 %v912_v10 }
 0x286   :  { %1042 = vmatprep.subr.mxu1 %v4796_v32 }
 0x287   :  { %1043 = vmatpush2.msra.mxu1 %v911_v11 }
 0x288   :  { %1044 = vmatprep.subr.mxu1 %v4796_v32 }
 0x289   :  { %1045 = vmatpush2.msra.mxu1 %v910_v12 }
 0x28a   :  { %1046 = vmatprep.subr.mxu1 %v4796_v32 }
 0x28b   :  { %1047 = vmatpush2.msra.mxu1 %v909_v13 }
 0x28c   :  { %1048 = vmatprep.subr.mxu1 %v4796_v32 }
 0x28d   :  { %1049 = vmatpush2.msra.mxu1 %v908_v14 }
 0x28e   :  { %1050 = vmatprep.subr.mxu1 %v4796_v32 }
 0x28f   :  { %1051 = vmatpush2.msra.mxu1 %v907_v15 }
 0x290   :  { %1052 = vmatprep.subr.mxu1 %v4796_v32 }
 0x291   :  { %1053 = vmatpush2.msra.mxu1 %v906_v16 }
 0x322   :  { %v813_v28 = vpop.f32.mrf.mxu1 }
 0x323   :  { %v824_v30 = vadd.f32 %v813_v28, %v634_v26  ;;  %v1077_v26 = vld [vmem:[#allocation8 + $0x28] sm:$0xff]  ;;  %v1075_v28 = vld [vmem:[#allocation8 + $0x18] sm:$0xff] }
 0x324   :  { %v815_v33 = vpop.f32.mrf.mxu1  ;;  %1108 = vmatprep.subr.mxu0 %v1077_v26  ;;  %1183 = vmatprep.subr.mxu1 %v1077_v26 }
 0x325   :  { %v840_v35 = vadd.f32 %v833_v27, %v824_v30  ;;  %v825_v36 = vadd.f32 %v815_v33, %v636_v29  ;;  %v1074_v29 = vld [vmem:[#allocation8 + $0x10] sm:$0xff]  ;;  %v1073_v30 = vld [vmem:[#allocation8 + $0x8] sm:$0xff] }
 0x326   :  { %v819_v37 = vpop.f32.mrf.mxu1 }
 0x327   :  { %v841_v39 = vadd.f32 %v837_v31, %v825_v36  ;;  %v826_v40 = vadd.f32 %v819_v37, %v640_v34  ;;  %v5138_v41 = vmax.f32 %v840_v35, 0.0 }
 0x328   :  { %v821_v42 = vpop.f32.mrf.mxu1 }
 0x329   :  { %v5140_v43 = vmax.f32 %v841_v39, 0.0  ;;  %v842_v44 = vadd.f32 %v833_v27, %v826_v40  ;;  %v827_v45 = vadd.f32 %v821_v42, %v642_v38  ;;  %v868_v48 = vmul.f32 %v5138_v41, %v5138_v41  ;;  %v1076_v27 = vld [vmem:[#allocation8 + $0x20] sm:$0xff]  ;;  %v1063_v42 = vld [vmem:[%s5742_s16] sm:$0x3] }
 0x32b   :  { %v5142_v46 = vmax.f32 %v842_v44, 0.0  ;;  %v843_v47 = vadd.f32 %v837_v31, %v827_v45  ;;  %v869_v49 = vmul.f32 %v5140_v43, %v5140_v43  ;;  %v856_v53 = vsel %vm855_vm2, %v5140_v43, 0.0  ;;  %v1072_v31 = vld [vmem:[#allocation8] sm:$0xff] }
 0x32d   :  { %v848_v50 = vadd.f32 %v5142_v46, %v5138_v41  ;;  %v870_v51 = vmul.f32 %v5142_v46, %v5142_v46  ;;  %v5152_v52 = vmax.f32 %v843_v47, 0.0  ;;  %v879_v59 = vsel %vm855_vm2, %v869_v49, 0.0 }
 0x32f   :  { %v849_v54 = vrot.slane %v848_v50, 4  ;;  %v872_v55 = vadd.f32 %v870_v51, %v868_v48  ;;  %v857_v56 = vsel %vm855_vm2, %v5152_v52, 0.0  ;;  %v871_v57 = vmul.f32 %v5152_v52, %v5152_v52  ;;  %v1444_v51 = vld [vmem:[#allocation10 + $0x138] sm:$0xff] }
 0x330   :  { %v858_v58 = vadd.f32 %v857_v56, %v856_v53  ;;  %v1443_v53 = vld [vmem:[#allocation10 + $0x130] sm:$0xff]  ;;  %v1440_v56 = vld [vmem:[#allocation10 + $0x118] sm:$0xff] }
 0x331   :  { %v850_v60 = vadd.f32 %v849_v54, %v848_v50  ;;  %v873_v61 = vrot.slane %v872_v55, 4  ;;  %v880_v62 = vsel %vm855_vm2, %v871_v57, 0.0  ;;  %v1442_v54 = vld [vmem:[#allocation10 + $0x128] sm:$0xff]  ;;  %v1439_v57 = vld [vmem:[#allocation10 + $0x110] sm:$0xff] }
 0x332   :  { %v859_v63 = vrot.slane %v858_v58, 4  ;;  %v881_v0 = vadd.f32 %v880_v62, %v879_v59  ;;  %v1437_v59 = vld [vmem:[#allocation10 + $0x100] sm:$0xff]  ;;  %v1434_v62 = vld [vmem:[#allocation10 + $0xe8] sm:$0xff] }
 0x333   :  { %v851_v1 = vrot.slane %v850_v60, 2  ;;  %v874_v2 = vadd.f32 %v873_v61, %v872_v55  ;;  %v1441_v55 = vld [vmem:[#allocation10 + $0x120] sm:$0xff]  ;;  %v1435_v61 = vld [vmem:[#allocation10 + $0xf0] sm:$0xff] }
 0x334   :  { %v860_v3 = vadd.f32 %v859_v63, %v858_v58  ;;  %v882_v4 = vrot.slane %v881_v0, 4  ;;  %v1438_v58 = vld [vmem:[#allocation10 + $0x108] sm:$0xff]  ;;  %v1433_v63 = vld [vmem:[#allocation10 + $0xe0] sm:$0xff] }
 0x335   :  { %v875_v5 = vrot.slane %v874_v2, 2  ;;  %v852_v6 = vadd.f32 %v851_v1, %v850_v60  ;;  %v1436_v60 = vld [vmem:[#allocation10 + $0xf8] sm:$0xff]  ;;  %v1431_v1 = vld [vmem:[#allocation10 + $0xd0] sm:$0xff] }
 0x336   :  { %v861_v7 = vrot.slane %v860_v3, 2  ;;  %v883_v8 = vadd.f32 %v882_v4, %v881_v0  ;;  %v1432_v0 = vld [vmem:[#allocation10 + $0xd8] sm:$0xff] }
 0x337   :  { %v876_v9 = vadd.f32 %v875_v5, %v874_v2  ;;  %v853_v10 = vrot.slane %v852_v6, 1  ;;  %v1430_v2 = vld [vmem:[#allocation10 + $0xc8] sm:$0xff]  ;;  %v1452_v4 = vld [vmem:[#allocation10 + $0x178] sm:$0xff]  ;;  %v1451_v5 = vld [vmem:[#allocation10 + $0x170] sm:$0xff] }
 0x338   :  { %v862_v11 = vadd.f32 %v861_v7, %v860_v3  ;;  %v884_v12 = vrot.slane %v883_v8, 2  ;;  %v1429_v3 = vld [vmem:[#allocation10 + $0xc0] sm:$0xff] }
 0x339   :  { %v877_v13 = vrot.slane %v876_v9, 1  ;;  %v854_v16 = vadd.f32 %v853_v10, %v852_v6  ;;  %v1450_v6 = vld [vmem:[#allocation10 + $0x168] sm:$0xff]  ;;  %v1449_v7 = vld [vmem:[#allocation10 + $0x160] sm:$0xff] }
 0x33a   :  { %v863_v14 = vrot.slane %v862_v11, 1  ;;  %v885_v15 = vadd.f32 %v884_v12, %v883_v8  ;;  %v1448_v8 = vld [vmem:[#allocation10 + $0x158] sm:$0xff]  ;;  %v1446_v10 = vld [vmem:[#allocation10 + $0x148] sm:$0xff] }
 0x33b   :  { %v878_v19 = vadd.f32 %v877_v13, %v876_v9  ;;  %v866_v23 = vmul.f32 0.0625, %v854_v16  ;;  %v1447_v9 = vld [vmem:[#allocation10 + $0x150] sm:$0xff] }
 0x33c   :  { %v864_v17 = vadd.f32 %v863_v14, %v862_v11  ;;  %v886_v18 = vrot.slane %v885_v15, 1  ;;  %v1445_v11 = vld [vmem:[#allocation10 + $0x140] sm:$0xff] }
 0x33d   :  { %v888_v25 = vmul.f32 0.0625, %v878_v19 }
 0x33e   :  { %v867_v20 = vmul.f32 0.0625, %v864_v17  ;;  %v887_v21 = vadd.f32 %v886_v18, %v885_v15 }
 0x340   :  { %3820 = vmatprep.mubr.msk.f32.mxu0 %vm855_vm2, %v867_v20  ;;  %v889_v24 = vmul.f32 0.0625, %v887_v21 }
 0x341   :  { %982 = vmatmul.mubr.f32.vlgmr.msra.gmra.mxu0 %v866_v23 }
 0x342   :  { %3821 = vmatprep.mubr.msk.f32.mxu1 %vm855_vm2, %v889_v24  ;;  %1146 = vmatprep.mubr.f32.mxu0 %v4796_v32 }
 0x343   :  { %1055 = vmatmul.mubr.f32.vlgmr.msra.gmra.mxu1 %v888_v25  ;;  %1109 = vmatpush1.msra.mxu0 %v1076_v27 }
 0x344   :  { %1221 = vmatprep.mubr.f32.mxu1 %v4796_v32  ;;  %1184 = vmatpush1.msra.mxu1 %v1076_v27 }
 0x345   :  { %1110 = vmatprep.subr.mxu0 %v1075_v28  ;;  %1185 = vmatprep.subr.mxu1 %v1075_v28 }
 0x346   :  { %1111 = vmatpush1.msra.mxu0 %v1074_v29  ;;  %1186 = vmatpush1.msra.mxu1 %v1074_v29  ;;  %v1341_v29 = vld [vmem:[#allocation10 + $0x68] sm:$0xff] }
 0x347   :  { %1112 = vmatprep.subr.mxu0 %v1073_v30  ;;  %1187 = vmatprep.subr.mxu1 %v1073_v30  ;;  %v1340_v30 = vld [vmem:[#allocation10 + $0x60] sm:$0xff] }
 0x348   :  { %1113 = vmatpush1.msra.mxu0 %v1072_v31  ;;  %1188 = vmatpush1.msra.mxu1 %v1072_v31  ;;  %v1339_v31 = vld [vmem:[#allocation10 + $0x58] sm:$0xff] }
 0x349   :  { %1456 = vmatprep.subr.mxu1 %v4796_v32 }
 0x401   :  { %v983_v33 = vpop.f32.mrf.mxu0 }
 0x402   :  { %v1060_v34 = vmul.f32 %v983_v33, %v983_v33 }
 0x403   :  { %v985_v35 = vpop.f32.mrf.mxu0  ;;  %v1056_v36 = vpop.f32.mrf.mxu1 }
 0x404   :  { %v1061_v37 = vsub.f32 %v1056_v36, %v1060_v34  ;;  %v1337_v34 = vld [vmem:[#allocation10 + $0x48] sm:$0xff]  ;;  %v1336_v35 = vld [vmem:[#allocation10 + $0x40] sm:$0xff]  ;;  %v1335_v36 = vld [vmem:[#allocation10 + $0x38] sm:$0xff] }
 0x405   :  { %v1058_v38 = vpop.f32.mrf.mxu1 }
 0x406   :  { %v1062_v39 = vmax.f32 %v1061_v37, 0.0  ;;  %v1334_v37 = vld [vmem:[#allocation10 + $0x30] sm:$0xff]  ;;  %v1333_v38 = vld [vmem:[#allocation10 + $0x28] sm:$0xff] }
 0x408   :  { %v1064_v40 = vadd.f32 1e-05, %v1062_v39  ;;  %v1332_v39 = vld [vmem:[#allocation10 + $0x20] sm:$0xff] }
 0x40a   :  { %4429 = vrsqrt.f32 %v1064_v40  ;;  %v1331_v40 = vld [vmem:[#allocation10 + $0x18] sm:$0xff] }
 0x417   :  { %v4430_v44 = vpop.eup %4429 }
 0x418   :  { %v1066_v45 = vmul.f32 %v4430_v44, %v1063_v42  ;;  %v1329_v44 = vld [vmem:[#allocation10 + $0x8] sm:$0xff] }
 0x41a   :  { %v1067_v47 = vmul.f32 %v1066_v45, %v983_v33  ;;  %3822 = vmatmul.mubr.msk.f32.vlgmr.msra.gmra.mxu0 %vm1078_vm3, %v1066_v45  ;;  %v1338_v33 = vld [vmem:[#allocation10 + $0x50] sm:$0xff]  ;;  %v1328_v45 = vld [vmem:[#allocation10] sm:$0xff] }
 0x41b   :  { %1321 = vmatprep.mubr.f32.mxu0 %v4796_v32 }
 0x41c   :  { %v1069_v48 = vrot.slane %v1067_v47, 7  ;;  %v1351_v47 = vld [vmem:[#allocation10 + $0xb8] sm:$0xff] }
 0x41e   :  { %v1071_v49 = vsub.f32 %v1063_v42, %v1069_v48  ;;  %v1330_v42 = vld [vmem:[#allocation10 + $0x10] sm:$0xff] }
 0x41f   :  { %v1350_v48 = vld [vmem:[#allocation10 + $0xb0] sm:$0xff] }
 0x420   :  { %v1154_v50 = vrot.slane %v1071_v49, 1  ;;  %v1349_v49 = vld [vmem:[#allocation10 + $0xa8] sm:$0xff] }
 0x422   :  { %3823 = vmatmul.mubr.msk.f32.vlgmr.msra.gmra.mxu1 %vm1078_vm3, %v1154_v50  ;;  %v1348_v50 = vld [vmem:[#allocation10 + $0xa0] sm:$0xff] }
 0x423   :  { %1457 = vmatpush1.msra.mxu1 %v1444_v51  ;;  %v1347_v51 = vld [vmem:[#allocation10 + $0x98] sm:$0xff] }
 0x424   :  { %1458 = vmatprep.subr.mxu1 %v4796_v32 }
 0x425   :  { %1459 = vmatpush1.msra.mxu1 %v1443_v53  ;;  %v1346_v53 = vld [vmem:[#allocation10 + $0x90] sm:$0xff] }
 0x426   :  { %1460 = vmatprep.subr.mxu1 %v4796_v32 }
 0x427   :  { %1461 = vmatpush1.msra.mxu1 %v1442_v54  ;;  %v1345_v54 = vld [vmem:[#allocation10 + $0x88] sm:$0xff] }
 0x428   :  { %1462 = vmatprep.subr.mxu1 %v4796_v32 }
 0x429   :  { %1463 = vmatpush1.msra.mxu1 %v1441_v55  ;;  %v1344_v55 = vld [vmem:[#allocation10 + $0x80] sm:$0xff] }
 0x42a   :  { %1464 = vmatprep.subr.mxu1 %v4796_v32 }
 0x42b   :  { %1465 = vmatpush1.msra.mxu1 %v1440_v56 }
 0x42c   :  { %1466 = vmatprep.subr.mxu1 %v4796_v32 }
 0x42d   :  { %1467 = vmatpush1.msra.mxu1 %v1439_v57 }
 0x42e   :  { %1468 = vmatprep.subr.mxu1 %v4796_v32 }
 0x42f   :  { %1469 = vmatpush1.msra.mxu1 %v1438_v58  ;;  %v1691_v58 = vld [vmem:[#allocation10 + $0x1f8] sm:$0xff] }
 0x430   :  { %1470 = vmatprep.subr.mxu1 %v4796_v32 }
 0x431   :  { %1471 = vmatpush1.msra.mxu1 %v1437_v59 }
 0x432   :  { %1472 = vmatprep.subr.mxu1 %v4796_v32 }
 0x433   :  { %1473 = vmatpush1.msra.mxu1 %v1436_v60  ;;  %v1690_v60 = vld [vmem:[#allocation10 + $0x1f0] sm:$0xff] }
 0x434   :  { %1474 = vmatprep.subr.mxu1 %v4796_v32 }
 0x435   :  { %1475 = vmatpush1.msra.mxu1 %v1435_v61 }
 0x436   :  { %1476 = vmatprep.subr.mxu1 %v4796_v32 }
 0x437   :  { %1477 = vmatpush1.msra.mxu1 %v1434_v62  ;;  %v1689_v62 = vld [vmem:[#allocation10 + $0x1e8] sm:$0xff] }
 0x438   :  { %1478 = vmatprep.subr.mxu1 %v4796_v32 }
 0x439   :  { %1479 = vmatpush1.msra.mxu1 %v1433_v63  ;;  %v1600_v63 = vld [vmem:[#allocation11 + $0x10] sm:$0xff] }
 0x43a   :  { %1480 = vmatprep.subr.mxu1 %v4796_v32 }
 0x43b   :  { %1481 = vmatpush1.msra.mxu1 %v1432_v0  ;;  %v1688_v0 = vld [vmem:[#allocation10 + $0x1e0] sm:$0xff] }
 0x43c   :  { %1482 = vmatprep.subr.mxu1 %v4796_v32 }
 0x43d   :  { %1483 = vmatpush1.msra.mxu1 %v1431_v1  ;;  %v1687_v1 = vld [vmem:[#allocation10 + $0x1d8] sm:$0xff] }
 0x43e   :  { %1484 = vmatprep.subr.mxu1 %v4796_v32 }
 0x43f   :  { %1485 = vmatpush1.msra.mxu1 %v1430_v2  ;;  %v1686_v2 = vld [vmem:[#allocation10 + $0x1d0] sm:$0xff] }
 0x440   :  { %1486 = vmatprep.subr.mxu1 %v4796_v32 }
 0x441   :  { %1487 = vmatpush1.msra.mxu1 %v1429_v3  ;;  %v1685_v3 = vld [vmem:[#allocation10 + $0x1c8] sm:$0xff] }
 0x442   :  { %1504 = vmatprep.subr.mxu1 %v4796_v32 }
 0x443   :  { %1505 = vmatpush2.msra.mxu1 %v1452_v4  ;;  %v1684_v4 = vld [vmem:[#allocation10 + $0x1c0] sm:$0xff] }
 0x444   :  { %1506 = vmatprep.subr.mxu1 %v4796_v32 }
 0x445   :  { %1507 = vmatpush2.msra.mxu1 %v1451_v5  ;;  %v1683_v5 = vld [vmem:[#allocation10 + $0x1b8] sm:$0xff] }
 0x446   :  { %1508 = vmatprep.subr.mxu1 %v4796_v32 }
 0x447   :  { %1509 = vmatpush2.msra.mxu1 %v1450_v6  ;;  %v1682_v6 = vld [vmem:[#allocation10 + $0x1b0] sm:$0xff] }
 0x448   :  { %1510 = vmatprep.subr.mxu1 %v4796_v32 }
 0x449   :  { %1511 = vmatpush2.msra.mxu1 %v1449_v7  ;;  %v1681_v7 = vld [vmem:[#allocation10 + $0x1a8] sm:$0xff] }
 0x44a   :  { %1512 = vmatprep.subr.mxu1 %v4796_v32 }
 0x44b   :  { %1513 = vmatpush2.msra.mxu1 %v1448_v8  ;;  %v1680_v8 = vld [vmem:[#allocation10 + $0x1a0] sm:$0xff] }
 0x44c   :  { %1514 = vmatprep.subr.mxu1 %v4796_v32 }
 0x44d   :  { %1515 = vmatpush2.msra.mxu1 %v1447_v9  ;;  %v1679_v9 = vld [vmem:[#allocation10 + $0x198] sm:$0xff] }
 0x44e   :  { %1516 = vmatprep.subr.mxu1 %v4796_v32 }
 0x44f   :  { %1517 = vmatpush2.msra.mxu1 %v1446_v10  ;;  %v1678_v10 = vld [vmem:[#allocation10 + $0x190] sm:$0xff] }
 0x450   :  { %1518 = vmatprep.subr.mxu1 %v4796_v32 }
 0x451   :  { %1519 = vmatpush2.msra.mxu1 %v1445_v11  ;;  %v1677_v11 = vld [vmem:[#allocation10 + $0x188] sm:$0xff] }
 0x4da   :  { %v1148_v12 = vpop.f32.mrf.mxu0 }
 0x4db   :  { %v1231_v15 = vrot.slane %v1148_v12, %v5128_v22  ;;  %v1676_v12 = vld [vmem:[#allocation10 + $0x180] sm:$0xff] }
 0x4dc   :  { %v1150_v13 = vpop.f32.mrf.mxu0 }
 0x4dd   :  { %v1235_v14 = vrot.slane %v1150_v13, %v5128_v22  ;;  %v1238_v21 = vmul.f32 %v1231_v15, %v5142_v46  ;;  %v1236_v25 = vmul.f32 %v1231_v15, %v5138_v41  ;;  %v1353_v41 = vld [vmem:[#allocation11 + $0x8] sm:$0xff]  ;;  %v1342_v46 = vld [vmem:[#allocation10 + $0x70] sm:$0xff]  ;;  %v1699_v13 = vld [vmem:[#allocation10 + $0x238] sm:$0xff] }
 0x4de   :  { %v1697_v15 = vld [vmem:[#allocation10 + $0x228] sm:$0xff] }
 0x4df   :  { %v1239_v19 = vmul.f32 %v1235_v14, %v5152_v52  ;;  %v1237_v23 = vmul.f32 %v1235_v14, %v5140_v43  ;;  %v1252_v52 = vld [vmem:[#allocation11] sm:$0xff]  ;;  %v1343_v43 = vld [vmem:[#allocation10 + $0x78] sm:$0xff]  ;;  %v1698_v14 = vld [vmem:[#allocation10 + $0x230] sm:$0xff] }
 0x4e2   :  { %v1223_v16 = vpop.f32.mrf.mxu1 }
 0x4e3   :  { %v1243_v17 = vrot.slane %v1223_v16, %v5128_v22  ;;  %v1696_v16 = vld [vmem:[#allocation10 + $0x220] sm:$0xff] }
 0x4e4   :  { %v1225_v18 = vpop.f32.mrf.mxu1 }
 0x4e5   :  { %v1247_v20 = vrot.slane %v1225_v18, %v5128_v22  ;;  %v5204_v26 = vadd.f32 %v1243_v17, %v1238_v21  ;;  %v5208_v28 = vadd.f32 %v1243_v17, %v1236_v25  ;;  %v1695_v17 = vld [vmem:[#allocation10 + $0x218] sm:$0xff]  ;;  %v1694_v18 = vld [vmem:[#allocation10 + $0x210] sm:$0xff] }
 0x4e6   :  { %v5275_v21 = vld [vmem:[#allocation13 + $0x58] sm:$0xff] }
 0x4e7   :  { %v1251_v24 = vadd.f32 %v1247_v20, %v1239_v19  ;;  %v5206_v27 = vadd.f32 %v1247_v20, %v1237_v23  ;;  %v1693_v19 = vld [vmem:[#allocation10 + $0x208] sm:$0xff]  ;;  %v1692_v20 = vld [vmem:[#allocation10 + $0x200] sm:$0xff] }
 0x4e9   :  { %1285 = vmatprep.subr.mxu0 %v1251_v24  ;;  %1632 = vmatprep.subr.mxu1 %v1251_v24 }
 0x4ea   :  { %1286 = vmatpush1.msra.mxu0 %v5204_v26 }
 0x4eb   :  { %1287 = vmatprep.subr.mxu0 %v5206_v27 }
 0x4ec   :  { %1288 = vmatpush1.msra.mxu0 %v5208_v28 }
 0x4ed   :  { %3824 = vmatmul.mubr.msk.f32.vlgmr.msra.gmra.mxu0 %vm1253_vm4, %v1252_v52  ;;  %1385 = vmatprep.subr.mxu0 %v1251_v24 }
 0x4ee   :  { %1386 = vmatpush1.msra.mxu0 %v5204_v26  ;;  %1421 = vmatprep.mubr.f32.mxu0 %v4796_v32 }
 0x4ef   :  { %1387 = vmatprep.subr.mxu0 %v5206_v27 }
 0x4f0   :  { %1388 = vmatpush1.msra.mxu0 %v5208_v28 }
 0x4f1   :  { %3825 = vmatmul.mubr.msk.f32.vlgmr.msra.gmra.mxu0 %vm1253_vm4, %v1353_v41  ;;  %1529 = vmatprep.subr.mxu0 %v4796_v32  ;;  %v1812_v41 = vld [vmem:[#allocation13 + $0x50] sm:$0xff] }
 0x4f2   :  { %1530 = vmatpush1.msra.mxu0 %v1343_v43  ;;  %v1811_v43 = vld [vmem:[#allocation13 + $0x48] sm:$0xff] }
 0x4f3   :  { %1531 = vmatprep.subr.mxu0 %v4796_v32 }
 0x4f4   :  { %1532 = vmatpush1.msra.mxu0 %v1342_v46  ;;  %v1810_v46 = vld [vmem:[#allocation13 + $0x40] sm:$0xff] }
 0x4f5   :  { %1533 = vmatprep.subr.mxu0 %v4796_v32 }
 0x4f6   :  { %1534 = vmatpush1.msra.mxu0 %v1341_v29  ;;  %v1809_v29 = vld [vmem:[#allocation13 + $0x38] sm:$0xff] }
 0x4f7   :  { %1535 = vmatprep.subr.mxu0 %v4796_v32 }
 0x4f8   :  { %1536 = vmatpush1.msra.mxu0 %v1340_v30  ;;  %v1808_v30 = vld [vmem:[#allocation13 + $0x30] sm:$0xff] }
 0x4f9   :  { %1537 = vmatprep.subr.mxu0 %v4796_v32 }
 0x4fa   :  { %1538 = vmatpush1.msra.mxu0 %v1339_v31  ;;  %v1807_v31 = vld [vmem:[#allocation13 + $0x28] sm:$0xff] }
 0x4fb   :  { %1539 = vmatprep.subr.mxu0 %v4796_v32 }
 0x4fc   :  { %1540 = vmatpush1.msra.mxu0 %v1338_v33  ;;  %v1806_v33 = vld [vmem:[#allocation13 + $0x20] sm:$0xff] }
 0x4fd   :  { %1541 = vmatprep.subr.mxu0 %v4796_v32 }
 0x4fe   :  { %1542 = vmatpush1.msra.mxu0 %v1337_v34  ;;  %v1805_v34 = vld [vmem:[#allocation13 + $0x18] sm:$0xff] }
 0x4ff   :  { %1543 = vmatprep.subr.mxu0 %v4796_v32 }
 0x500   :  { %1544 = vmatpush1.msra.mxu0 %v1336_v35  ;;  %v1804_v35 = vld [vmem:[#allocation13 + $0x10] sm:$0xff] }
 0x501   :  { %1545 = vmatprep.subr.mxu0 %v4796_v32 }
 0x502   :  { %1546 = vmatpush1.msra.mxu0 %v1335_v36  ;;  %v1803_v36 = vld [vmem:[#allocation13 + $0x8] sm:$0xff] }
 0x503   :  { %1547 = vmatprep.subr.mxu0 %v4796_v32 }
 0x504   :  { %1548 = vmatpush1.msra.mxu0 %v1334_v37  ;;  %v1802_v37 = vld [vmem:[#allocation13] sm:$0xff] }
 0x505   :  { %1549 = vmatprep.subr.mxu0 %v4796_v32 }
 0x506   :  { %1550 = vmatpush1.msra.mxu0 %v1333_v38 }
 0x507   :  { %1551 = vmatprep.subr.mxu0 %v4796_v32 }
 0x508   :  { %1552 = vmatpush1.msra.mxu0 %v1332_v39  ;;  %v3830_v39 = vld [vmem:[#allocation16] ss:$0 sm:$0xff] }
 0x509   :  { %1553 = vmatprep.subr.mxu0 %v4796_v32 }
 0x50a   :  { %1554 = vmatpush1.msra.mxu0 %v1331_v40 }
 0x50b   :  { %1555 = vmatprep.subr.mxu0 %v4796_v32 }
 0x50c   :  { %1556 = vmatpush1.msra.mxu0 %v1330_v42 }
 0x50d   :  { %1557 = vmatprep.subr.mxu0 %v4796_v32 }
 0x50e   :  { %1558 = vmatpush1.msra.mxu0 %v1329_v44 }
 0x50f   :  { %1559 = vmatprep.subr.mxu0 %v4796_v32 }
 0x510   :  { %1560 = vmatpush1.msra.mxu0 %v1328_v45 }
 0x511   :  { %1577 = vmatprep.subr.mxu0 %v4796_v32 }
 0x512   :  { %1578 = vmatpush2.msra.mxu0 %v1351_v47 }
 0x513   :  { %1579 = vmatprep.subr.mxu0 %v4796_v32 }
 0x514   :  { %1580 = vmatpush2.msra.mxu0 %v1350_v48 }
 0x515   :  { %1581 = vmatprep.subr.mxu0 %v4796_v32 }
 0x516   :  { %1582 = vmatpush2.msra.mxu0 %v1349_v49 }
 0x517   :  { %1583 = vmatprep.subr.mxu0 %v4796_v32 }
 0x518   :  { %1584 = vmatpush2.msra.mxu0 %v1348_v50 }
 0x519   :  { %1585 = vmatprep.subr.mxu0 %v4796_v32 }
 0x51a   :  { %1586 = vmatpush2.msra.mxu0 %v1347_v51 }
 0x51b   :  { %1587 = vmatprep.subr.mxu0 %v4796_v32 }
 0x51c   :  { %1588 = vmatpush2.msra.mxu0 %v1346_v53 }
 0x51d   :  { %1589 = vmatprep.subr.mxu0 %v4796_v32 }
 0x51e   :  { %1590 = vmatpush2.msra.mxu0 %v1345_v54 }
 0x51f   :  { %1591 = vmatprep.subr.mxu0 %v4796_v32 }
 0x520   :  { %1592 = vmatpush2.msra.mxu0 %v1344_v55 }
 0x521   :  { %1703 = vmatprep.subr.mxu0 %v4796_v32 }
 0x5ad   :  { %v1323_v56 = vpop.f32.mrf.mxu0 }
 0x5af   :  { %v1325_v57 = vpop.f32.mrf.mxu0 }
 0x5b0   :  { %3827 = vmatprep.mubr.msk.f32.mxu0 %vm855_vm2, %v1325_v57 }
 0x5b1   :  { %v1423_v59 = vpop.f32.mrf.mxu0  ;;  %1594 = vmatmul.mubr.f32.vlgmr.msra.gmra.mxu0 %v1323_v56 }
 0x5b2   :  { %1704 = vmatpush1.msra.mxu0 %v1691_v58 }
 0x5b3   :  { %v1425_v61 = vpop.f32.mrf.mxu0  ;;  %1705 = vmatprep.subr.mxu0 %v4796_v32 }
 0x5b4   :  { %3826 = vmatprep.mubr.msk.f32.mxu1 %vm855_vm2, %v1425_v61  ;;  %1706 = vmatpush1.msra.mxu0 %v1690_v60 }
 0x5b5   :  { %1521 = vmatmul.mubr.f32.vlgmr.msra.gmra.mxu1 %v1423_v59  ;;  %1707 = vmatprep.subr.mxu0 %v4796_v32 }
 0x5b6   :  { %1633 = vmatpush1.msra.mxu1 %v5204_v26  ;;  %1668 = vmatprep.mubr.f32.mxu1 %v4796_v32 }
 0x5b7   :  { %1634 = vmatprep.subr.mxu1 %v5206_v27  ;;  %1708 = vmatpush1.msra.mxu0 %v1689_v62 }
 0x5b8   :  { %1635 = vmatpush1.msra.mxu1 %v5208_v28  ;;  %1709 = vmatprep.subr.mxu0 %v4796_v32 }
 0x5b9   :  { %3828 = vmatmul.mubr.msk.f32.vlgmr.msra.gmra.mxu1 %vm1253_vm4, %v1600_v63  ;;  %1710 = vmatpush1.msra.mxu0 %v1688_v0 }
 0x5ba   :  { %1711 = vmatprep.subr.mxu0 %v4796_v32  ;;  %4093 = vmatprep.subr.mxu1 %v4796_v32 }
 0x5bb   :  { %1712 = vmatpush1.msra.mxu0 %v1687_v1  ;;  %4094 = vmatpush3.msra.mxu1 %v5275_v21  ;;  %v1974_v1 = vld [vmem:[#allocation14 + $0x10] sm:$0xff] }
 0x5bc   :  { %1713 = vmatprep.subr.mxu0 %v4796_v32  ;;  %4095 = vmatprep.subr.mxu1 %v4796_v32 }
 0x5bd   :  { %1714 = vmatpush1.msra.mxu0 %v1686_v2  ;;  %4096 = vmatpush3.msra.mxu1 %v1812_v41  ;;  %v1973_v2 = vld [vmem:[#allocation14 + $0x8] sm:$0xff] }
 0x5be   :  { %1715 = vmatprep.subr.mxu0 %v4796_v32  ;;  %4097 = vmatprep.subr.mxu1 %v4796_v32 }
 0x5bf   :  { %1716 = vmatpush1.msra.mxu0 %v1685_v3  ;;  %4098 = vmatpush3.msra.mxu1 %v1811_v43  ;;  %v1972_v3 = vld [vmem:[#allocation14] sm:$0xff] }
 0x5c0   :  { %1717 = vmatprep.subr.mxu0 %v4796_v32  ;;  %4099 = vmatprep.subr.mxu1 %v4796_v32 }
 0x5c1   :  { %1718 = vmatpush1.msra.mxu0 %v1684_v4  ;;  %4100 = vmatpush3.msra.mxu1 %v1810_v46 }
 0x5c2   :  { %1719 = vmatprep.subr.mxu0 %v4796_v32  ;;  %4101 = vmatprep.subr.mxu1 %v4796_v32 }
 0x5c3   :  { %1720 = vmatpush1.msra.mxu0 %v1683_v5  ;;  %4102 = vmatpush3.msra.mxu1 %v1809_v29 }
 0x5c4   :  { %1721 = vmatprep.subr.mxu0 %v4796_v32  ;;  %4103 = vmatprep.subr.mxu1 %v4796_v32 }
 0x5c5   :  { %1722 = vmatpush1.msra.mxu0 %v1682_v6  ;;  %4104 = vmatpush3.msra.mxu1 %v1808_v30 }
 0x5c6   :  { %1723 = vmatprep.subr.mxu0 %v4796_v32  ;;  %4105 = vmatprep.subr.mxu1 %v4796_v32 }
 0x5c7   :  { %1724 = vmatpush1.msra.mxu0 %v1681_v7  ;;  %4106 = vmatpush3.msra.mxu1 %v1807_v31 }
 0x5c8   :  { %1725 = vmatprep.subr.mxu0 %v4796_v32  ;;  %4107 = vmatprep.subr.mxu1 %v4796_v32 }
 0x5c9   :  { %1726 = vmatpush1.msra.mxu0 %v1680_v8  ;;  %4108 = vmatpush3.msra.mxu1 %v1806_v33 }
 0x5ca   :  { %1727 = vmatprep.subr.mxu0 %v4796_v32  ;;  %4109 = vmatprep.subr.mxu1 %v4796_v32 }
 0x5cb   :  { %1728 = vmatpush1.msra.mxu0 %v1679_v9  ;;  %4110 = vmatpush3.msra.mxu1 %v1805_v34 }
 0x5cc   :  { %1729 = vmatprep.subr.mxu0 %v4796_v32  ;;  %4111 = vmatprep.subr.mxu1 %v4796_v32 }
 0x5cd   :  { %1730 = vmatpush1.msra.mxu0 %v1678_v10  ;;  %4112 = vmatpush3.msra.mxu1 %v1804_v35 }
 0x5ce   :  { %1731 = vmatprep.subr.mxu0 %v4796_v32  ;;  %4117 = vmatprep.mubr.msk.f32.mxu1 %vm4797_vm5, %v4796_v32 }
 0x5cf   :  { %1732 = vmatpush1.msra.mxu0 %v1677_v11  ;;  %4113 = vmatprep.subr.mxu1 %v4796_v32 }
 0x5d0   :  { %1733 = vmatprep.subr.mxu0 %v4796_v32  ;;  %4114 = vmatpush3.msra.mxu1 %v1803_v36 }
 0x5d1   :  { %1734 = vmatpush1.msra.mxu0 %v1676_v12  ;;  %4115 = vmatprep.subr.mxu1 %v4796_v32  ;;  %v1963_v12 = vld [vmem:[%s5706_s12] sm:$0x3] }
 0x5d2   :  { %1751 = vmatprep.subr.mxu0 %v4796_v32  ;;  %4116 = vmatpush3.msra.mxu1 %v1802_v37 }
 0x5d3   :  { %1752 = vmatpush2.msra.mxu0 %v1699_v13  ;;  %4120 = vmatprep.subr.mxu1 %v4796_v32 }
 0x5d4   :  { %1753 = vmatprep.subr.mxu0 %v4796_v32 }
 0x5d5   :  { %1754 = vmatpush2.msra.mxu0 %v1698_v14 }
 0x5d6   :  { %1755 = vmatprep.subr.mxu0 %v4796_v32 }
 0x5d7   :  { %1756 = vmatpush2.msra.mxu0 %v1697_v15 }
 0x5d8   :  { %1757 = vmatprep.subr.mxu0 %v4796_v32 }
 0x5d9   :  { %1758 = vmatpush2.msra.mxu0 %v1696_v16 }
 0x5da   :  { %1759 = vmatprep.subr.mxu0 %v4796_v32 }
 0x5db   :  { %1760 = vmatpush2.msra.mxu0 %v1695_v17 }
 0x5dc   :  { %1761 = vmatprep.subr.mxu0 %v4796_v32 }
 0x5dd   :  { %1762 = vmatpush2.msra.mxu0 %v1694_v18 }
 0x5de   :  { %1763 = vmatprep.subr.mxu0 %v4796_v32 }
 0x5df   :  { %1764 = vmatpush2.msra.mxu0 %v1693_v19 }
 0x5e0   :  { %1765 = vmatprep.subr.mxu0 %v4796_v32 }
 0x5e1   :  { %1766 = vmatpush2.msra.mxu0 %v1692_v20 }
 0x5e2   :  { %4147 = vmatprep.subr.mxu0 %v4796_v32 }
 0x671   :  { %v1595_v23 = vpop.f32.mrf.mxu0 }
 0x673   :  { %v1597_v24 = vpop.f32.mrf.mxu0 }
 0x675   :  { %v1522_v25 = vpop.f32.mrf.mxu1 }
 0x676   :  { %v1596_v26 = vadd.f32 %v1595_v23, %v1522_v25 }
 0x677   :  { %v1524_v27 = vpop.f32.mrf.mxu1 }
 0x679   :  { %v1670_v28 = vpop.f32.mrf.mxu1 }
 0x67b   :  { %v1672_v52 = vpop.f32.mrf.mxu1 }
 0x67c   :  { %3829 = vmatprep.mubr.msk.f32.mxu0 %vm855_vm2, %v1672_v52  ;;  %v2220_v52 = vld [vmem:[#allocation17 + $0x4] sm:$0xf] }
 0x67d   :  { %1768 = vmatmul.mubr.f32.vlgmr.msra.gmra.mxu0 %v1670_v28  ;;  %v2132_v28 = vld [vmem:[#allocation17] sm:$0xf] }
 0x67e   :  { %4153 = vmatprep.mubr.msk.f32.mxu0 %vm4797_vm5, %v4796_v32  ;;  %4148 = vmatpush3.msra.mxu0 %v1974_v1 }
 0x67f   :  { %4149 = vmatprep.subr.mxu0 %v4796_v32 }
 0x680   :  { %4150 = vmatpush3.msra.mxu0 %v1973_v2 }
 0x681   :  { %4151 = vmatprep.subr.mxu0 %v4796_v32 }
 0x682   :  { %4152 = vmatpush3.msra.mxu0 %v1972_v3 }
 0x683   :  { %4165 = vmatprep.subr.mxu0 %v4796_v32 }
 0x73d   :  { %v1769_v38 = vpop.f32.mrf.mxu0 }
 0x73e   :  { %v1773_v40 = vadd.f32 %v1769_v38, %v1596_v26  ;;  %v2213_v38 = vld [vmem:[%s5707_s13 + $0x30] sm:$0xff] }
 0x73f   :  { %v1771_v42 = vpop.f32.mrf.mxu0 }
 0x740   :  { %v1781_v44 = vadd.f32 %v3830_v39, %v1773_v40  ;;  %v3842_v39 = vld [vmem:[%s5707_s13 + $0x88] sm:$0xff]  ;;  %v3841_v42 = vld [vmem:[%s5707_s13 + $0x80] sm:$0xff] }
 0x741   :  { %v2212_v40 = vld [vmem:[%s5707_s13 + $0x28] sm:$0xff] }
 0x742   :  { %v5296_v45 = vmax.f32 %v1781_v44, 0.0  ;;  %v2211_v44 = vld [vmem:[%s5707_s13 + $0x20] sm:$0xff] }
 0x744   :  { %v1784_v47 = vsel %vm1783_vm6, %v5296_v45, 0.0  ;;  %v1793_v51 = vmul.f32 %v5296_v45, %v5296_v45 }
 0x745   :  { %v1785_v48 = vrot.slane %v1784_v47, 4 }
 0x746   :  { %v1794_v55 = vsel %vm1783_vm6, %v1793_v51, 0.0  ;;  %v2208_v51 = vld [vmem:[%s5707_s13 + $0x8] sm:$0xff] }
 0x747   :  { %v1786_v49 = vadd.f32 %v1785_v48, %v1784_v47  ;;  %v1795_v57 = vrot.slane %v1794_v55, 4  ;;  %v2210_v47 = vld [vmem:[%s5707_s13 + $0x18] sm:$0xff]  ;;  %v3839_v48 = vld [vmem:[%s5707_s13 + $0x70] sm:$0xff] }
 0x749   :  { %v1787_v50 = vrot.slane %v1786_v49, 2  ;;  %v1796_v59 = vadd.f32 %v1795_v57, %v1794_v55  ;;  %v3863_v57 = vld [vmem:[%s5707_s13 + $0x118] sm:$0xff] }
 0x74b   :  { %v1788_v53 = vadd.f32 %v1787_v50, %v1786_v49  ;;  %v1797_v60 = vrot.slane %v1796_v59, 2  ;;  %v2209_v49 = vld [vmem:[%s5707_s13 + $0x10] sm:$0xff]  ;;  %v3838_v50 = vld [vmem:[%s5707_s13 + $0x68] sm:$0xff] }
 0x74d   :  { %v1789_v54 = vrot.slane %v1788_v53, 1  ;;  %v1798_v61 = vadd.f32 %v1797_v60, %v1796_v59  ;;  %v2454_v59 = vld [vmem:[#allocation17 + $0x8] sm:$0xf] }
 0x74f   :  { %v1790_v56 = vadd.f32 %v1789_v54, %v1788_v53  ;;  %v1799_v62 = vrot.slane %v1798_v61, 1  ;;  %v3837_v53 = vld [vmem:[%s5707_s13 + $0x60] sm:$0xff] }
 0x750   :  { %v2207_v54 = vld [vmem:[%s5707_s13] sm:$0xff] }
 0x751   :  { %v1792_v58 = vmul.f32 0.125, %v1790_v56  ;;  %v1800_v63 = vadd.f32 %v1799_v62, %v1798_v61  ;;  %v3862_v61 = vld [vmem:[%s5707_s13 + $0x110] sm:$0xff]  ;;  %v3861_v62 = vld [vmem:[%s5707_s13 + $0x108] sm:$0xff] }
 0x753   :  { %4118 = vmatmul.mubr.msk.f32.vlgmr.msra.gmra.mxu1 %vm1783_vm6, %v1792_v58  ;;  %v1801_v0 = vmul.f32 0.125, %v1800_v63  ;;  %v3860_v63 = vld [vmem:[%s5707_s13 + $0x100] sm:$0xff] }
 0x754   :  { %4121 = vmatpush3.msra.mxu1 %v5275_v21  ;;  %4144 = vmatprep.mubr.msk.f32.mxu1 %vm4797_vm5, %v4796_v32 }
 0x755   :  { %4122 = vmatprep.subr.mxu1 %v4796_v32 }
 0x756   :  { %4123 = vmatpush3.msra.mxu1 %v1812_v41  ;;  %v3848_v41 = vld [vmem:[%s5707_s13 + $0xb8] sm:$0xff] }
 0x757   :  { %4124 = vmatprep.subr.mxu1 %v4796_v32 }
 0x758   :  { %4125 = vmatpush3.msra.mxu1 %v1811_v43  ;;  %v2218_v43 = vld [vmem:[%s5707_s13 + $0x58] sm:$0xff] }
 0x759   :  { %4126 = vmatprep.subr.mxu1 %v4796_v32 }
 0x75a   :  { %4127 = vmatpush3.msra.mxu1 %v1810_v46  ;;  %v3847_v46 = vld [vmem:[%s5707_s13 + $0xb0] sm:$0xff] }
 0x75b   :  { %4128 = vmatprep.subr.mxu1 %v4796_v32 }
 0x75c   :  { %4129 = vmatpush3.msra.mxu1 %v1809_v29  ;;  %v2217_v29 = vld [vmem:[%s5707_s13 + $0x50] sm:$0xff] }
 0x75d   :  { %4130 = vmatprep.subr.mxu1 %v4796_v32 }
 0x75e   :  { %4131 = vmatpush3.msra.mxu1 %v1808_v30  ;;  %v3846_v30 = vld [vmem:[%s5707_s13 + $0xa8] sm:$0xff] }
 0x75f   :  { %4132 = vmatprep.subr.mxu1 %v4796_v32 }
 0x760   :  { %4133 = vmatpush3.msra.mxu1 %v1807_v31  ;;  %v2216_v31 = vld [vmem:[%s5707_s13 + $0x48] sm:$0xff] }
 0x761   :  { %4134 = vmatprep.subr.mxu1 %v4796_v32 }
 0x762   :  { %4135 = vmatpush3.msra.mxu1 %v1806_v33  ;;  %v3845_v33 = vld [vmem:[%s5707_s13 + $0xa0] sm:$0xff] }
 0x763   :  { %4136 = vmatprep.subr.mxu1 %v4796_v32 }
 0x764   :  { %4137 = vmatpush3.msra.mxu1 %v1805_v34  ;;  %v2215_v34 = vld [vmem:[%s5707_s13 + $0x40] sm:$0xff] }
 0x765   :  { %4138 = vmatprep.subr.mxu1 %v4796_v32 }
 0x766   :  { %4139 = vmatpush3.msra.mxu1 %v1804_v35  ;;  %v3844_v35 = vld [vmem:[%s5707_s13 + $0x98] sm:$0xff] }
 0x767   :  { %4140 = vmatprep.subr.mxu1 %v4796_v32 }
 0x768   :  { %4141 = vmatpush3.msra.mxu1 %v1803_v36  ;;  %v2214_v36 = vld [vmem:[%s5707_s13 + $0x38] sm:$0xff] }
 0x769   :  { %4142 = vmatprep.subr.mxu1 %v4796_v32 }
 0x76a   :  { %4143 = vmatpush3.msra.mxu1 %v1802_v37  ;;  %v3843_v37 = vld [vmem:[%s5707_s13 + $0x90] sm:$0xff] }
 0x76b   :  { %4145 = vmatmul.mubr.msk.f32.vlgmr.msra.gmra.mxu1 %vm1783_vm6, %v1801_v0  ;;  %4156 = vmatprep.subr.mxu1 %v4796_v32  ;;  %v3859_v0 = vld [vmem:[%s5707_s13 + $0xf8] sm:$0xff] }
 0x76c   :  { %4162 = vmatprep.mubr.msk.f32.mxu1 %vm4797_vm5, %v4796_v32  ;;  %4157 = vmatpush3.msra.mxu1 %v1974_v1  ;;  %v3858_v1 = vld [vmem:[%s5707_s13 + $0xf0] sm:$0xff] }
 0x76d   :  { %4158 = vmatprep.subr.mxu1 %v4796_v32 }
 0x76e   :  { %4159 = vmatpush3.msra.mxu1 %v1973_v2  ;;  %v3857_v2 = vld [vmem:[%s5707_s13 + $0xe8] sm:$0xff] }
 0x76f   :  { %4160 = vmatprep.subr.mxu1 %v4796_v32 }
 0x770   :  { %4161 = vmatpush3.msra.mxu1 %v1972_v3  ;;  %v3856_v3 = vld [vmem:[%s5707_s13 + $0xe0] sm:$0xff] }
 0x771   :  { %4170 = vmatprep.subr.mxu1 %v4796_v32 }
 0x813   :  { %v1883_v4 = vpop.f32.mrf.mxu1 }
 0x814   :  { %v1960_v6 = vmul.f32 %v1883_v4, %v1883_v4 }
 0x815   :  { %v4119_v5 = vpop.f32.mrf.mxu1 }
 0x816   :  { %v3854_v5 = vld [vmem:[%s5707_s13 + $0xd0] sm:$0xff] }
 0x82b   :  { %v1956_v7 = vpop.f32.mrf.mxu1 }
 0x82c   :  { %v1961_v8 = vsub.f32 %v1956_v7, %v1960_v6  ;;  %v3853_v6 = vld [vmem:[%s5707_s13 + $0xc8] sm:$0xff]  ;;  %v3852_v7 = vld [vmem:[%s5707_s13 + $0xc0] sm:$0xff] }
 0x82d   :  { %v4146_v9 = vpop.f32.mrf.mxu1 }
 0x82e   :  { %v1962_v10 = vmax.f32 %v1961_v8, 0.0 }
 0x830   :  { %v1964_v11 = vadd.f32 1e-05, %v1962_v10 }
 0x832   :  { %4431 = vrsqrt.f32 %v1964_v11 }
 0x83f   :  { %v4432_v13 = vpop.eup %4431 }
 0x840   :  { %v1966_v14 = vmul.f32 %v4432_v13, %v1963_v12 }
 0x842   :  { %v1967_v15 = vmul.f32 %v1966_v14, %v1883_v4  ;;  %4154 = vmatmul.mubr.msk.f32.vlgmr.msra.gmra.mxu0 %vm1078_vm3, %v1966_v14  ;;  %v3855_v4 = vld [vmem:[%s5707_s13 + $0xd8] sm:$0xff] }
 0x843   :  { %4167 = vmatprep.mubr.msk.f32.mxu0 %vm4797_vm5, %v4796_v32 }
 0x844   :  { %v1969_v16 = vrot.slane %v1967_v15, 7  ;;  %v2648_v15 = vld [vmem:[#allocation19 + $0x28] sm:$0xff] }
 0x846   :  { %v1971_v17 = vsub.f32 %v1963_v12, %v1969_v16  ;;  %v2647_v16 = vld [vmem:[#allocation19 + $0x20] sm:$0xff] }
 0x848   :  { %v2049_v18 = vrot.slane %v1971_v17, 1  ;;  %v2646_v17 = vld [vmem:[#allocation19 + $0x18] sm:$0xff] }
 0x84a   :  { %4163 = vmatmul.mubr.msk.f32.vlgmr.msra.gmra.mxu1 %vm1078_vm3, %v2049_v18  ;;  %v2645_v18 = vld [vmem:[#allocation19 + $0x10] sm:$0xff] }
 0x84b   :  { %4172 = vmatprep.mubr.msk.f32.mxu1 %vm4797_vm5, %v4796_v32 }
 0x902   :  { %v2044_v19 = vpop.f32.mrf.mxu0 }
 0x903   :  { %v2125_v21 = vrot.slane %v2044_v19, %v5128_v22  ;;  %v2644_v19 = vld [vmem:[#allocation19 + $0x8] sm:$0xff] }
 0x904   :  { %v4155_v20 = vpop.f32.mrf.mxu0 }
 0x905   :  { %v2126_v24 = vmul.f32 %v2125_v21, %v5296_v45  ;;  %v3840_v45 = vld [vmem:[%s5707_s13 + $0x78] sm:$0xff] }
 0x906   :  { %v2643_v20 = vld [vmem:[#allocation19] sm:$0xff] }
 0x90a   :  { %v2118_v23 = vpop.f32.mrf.mxu1 }
 0x90b   :  { %v2130_v25 = vrot.slane %v2118_v23, %v5128_v22  ;;  %v3865_v23 = vld [vmem:[#allocation22] ss:$0 sm:$0xff] }
 0x90c   :  { %v4164_v26 = vpop.f32.mrf.mxu1 }
 0x90d   :  { %v5340_v27 = vadd.f32 %v2130_v25, %v2126_v24 }
 0x90f   :  { %4166 = vmatpush3.msra.mxu0 %v5340_v27  ;;  %4171 = vmatpush3.msra.mxu1 %v5340_v27 }
 0x910   :  { %4168 = vmatmul.mubr.msk.f32.vlgmr.msra.gmra.mxu0 %vm2133_vm7, %v2132_v28  ;;  %4173 = vmatmul.mubr.msk.f32.vlgmr.msra.gmra.mxu1 %vm2133_vm7, %v2220_v52 }
 0x911   :  { %4175 = vmatprep.subr.mxu0 %v4796_v32  ;;  %4202 = vmatprep.subr.mxu1 %v4796_v32 }
 0x912   :  { %4176 = vmatpush3.msra.mxu0 %v3848_v41  ;;  %4203 = vmatpush3.msra.mxu1 %v2218_v43 }
 0x913   :  { %4177 = vmatprep.subr.mxu0 %v4796_v32  ;;  %4204 = vmatprep.subr.mxu1 %v4796_v32 }
 0x914   :  { %4178 = vmatpush3.msra.mxu0 %v3847_v46  ;;  %4205 = vmatpush3.msra.mxu1 %v2217_v29 }
 0x915   :  { %4179 = vmatprep.subr.mxu0 %v4796_v32  ;;  %4206 = vmatprep.subr.mxu1 %v4796_v32 }
 0x916   :  { %4180 = vmatpush3.msra.mxu0 %v3846_v30  ;;  %4207 = vmatpush3.msra.mxu1 %v2216_v31 }
 0x917   :  { %4181 = vmatprep.subr.mxu0 %v4796_v32  ;;  %4208 = vmatprep.subr.mxu1 %v4796_v32 }
 0x918   :  { %4182 = vmatpush3.msra.mxu0 %v3845_v33  ;;  %4209 = vmatpush3.msra.mxu1 %v2215_v34 }
 0x919   :  { %4183 = vmatprep.subr.mxu0 %v4796_v32  ;;  %4210 = vmatprep.subr.mxu1 %v4796_v32 }
 0x91a   :  { %4184 = vmatpush3.msra.mxu0 %v3844_v35  ;;  %4211 = vmatpush3.msra.mxu1 %v2214_v36 }
 0x91b   :  { %4185 = vmatprep.subr.mxu0 %v4796_v32  ;;  %4212 = vmatprep.subr.mxu1 %v4796_v32 }
 0x91c   :  { %4186 = vmatpush3.msra.mxu0 %v3843_v37  ;;  %4213 = vmatpush3.msra.mxu1 %v2213_v38 }
 0x91d   :  { %4187 = vmatprep.subr.mxu0 %v4796_v32  ;;  %4214 = vmatprep.subr.mxu1 %v4796_v32 }
 0x91e   :  { %4188 = vmatpush3.msra.mxu0 %v3842_v39  ;;  %4215 = vmatpush3.msra.mxu1 %v2212_v40 }
 0x91f   :  { %4189 = vmatprep.subr.mxu0 %v4796_v32  ;;  %4216 = vmatprep.subr.mxu1 %v4796_v32 }
 0x920   :  { %4190 = vmatpush3.msra.mxu0 %v3841_v42  ;;  %4217 = vmatpush3.msra.mxu1 %v2211_v44  ;;  %v2809_v44 = vld [vmem:[#allocation20 + $0x10] sm:$0xff] }
 0x921   :  { %4191 = vmatprep.subr.mxu0 %v4796_v32  ;;  %4218 = vmatprep.subr.mxu1 %v4796_v32 }
 0x922   :  { %4192 = vmatpush3.msra.mxu0 %v3840_v45  ;;  %4219 = vmatpush3.msra.mxu1 %v2210_v47  ;;  %v2808_v45 = vld [vmem:[#allocation20 + $0x8] sm:$0xff]  ;;  %v2807_v47 = vld [vmem:[#allocation20] sm:$0xff] }
 0x923   :  { %4193 = vmatprep.subr.mxu0 %v4796_v32  ;;  %4220 = vmatprep.subr.mxu1 %v4796_v32 }
 0x924   :  { %4194 = vmatpush3.msra.mxu0 %v3839_v48  ;;  %4221 = vmatpush3.msra.mxu1 %v2209_v49 }
 0x925   :  { %4195 = vmatprep.subr.mxu0 %v4796_v32  ;;  %4222 = vmatprep.subr.mxu1 %v4796_v32 }
 0x926   :  { %4196 = vmatpush3.msra.mxu0 %v3838_v50  ;;  %4223 = vmatpush3.msra.mxu1 %v2208_v51 }
 0x927   :  { %4197 = vmatprep.subr.mxu0 %v4796_v32  ;;  %4224 = vmatprep.subr.mxu1 %v4796_v32 }
 0x928   :  { %4198 = vmatpush3.msra.mxu0 %v3837_v53  ;;  %4199 = vmatprep.mubr.msk.f32.mxu0 %vm4797_vm5, %v4796_v32 }
 0x929   :  { %4226 = vmatprep.mubr.msk.f32.mxu1 %vm4797_vm5, %v4796_v32  ;;  %4229 = vmatprep.subr.mxu0 %v4796_v32 }
 0x92a   :  { %4225 = vmatpush3.msra.mxu1 %v2207_v54 }
 0x92b   :  { %4234 = vmatprep.subr.mxu1 %v4796_v32 }
 0x9d0   :  { %v2203_v55 = vpop.f32.mrf.mxu0  ;;  %v2290_v56 = vpop.f32.mrf.mxu1 }
 0x9d1   :  { %4200 = vmatmul.mubr.msk.f32.vlgmr.msra.gmra.mxu0 %vm1783_vm6, %v2290_v56  ;;  %4227 = vmatmul.mubr.msk.f32.vlgmr.msra.gmra.mxu1 %vm1783_vm6, %v2203_v55 }
 0x9d2   :  { %4230 = vmatpush3.msra.mxu0 %v5340_v27  ;;  %v4174_v58 = vpop.f32.mrf.mxu1  ;;  %4231 = vmatprep.mubr.msk.f32.mxu0 %vm4797_vm5, %v4796_v32  ;;  %v4169_v60 = vpop.f32.mrf.mxu0 }
 0x9d3   :  { %4235 = vmatpush3.msra.mxu1 %v3863_v57  ;;  %4258 = vmatprep.mubr.msk.f32.mxu1 %vm4797_vm5, %v4796_v32  ;;  %v2798_v57 = vld [vmem:[%s5712_s18] sm:$0x3] }
 0x9d4   :  { %4236 = vmatprep.subr.mxu1 %v4796_v32  ;;  %4261 = vmatprep.subr.mxu0 %v4796_v32 }
 0x9d5   :  { %4232 = vmatmul.mubr.msk.f32.vlgmr.msra.gmra.mxu0 %vm2133_vm7, %v2454_v59  ;;  %4237 = vmatpush3.msra.mxu1 %v3862_v61 }
 0x9d6   :  { %4238 = vmatprep.subr.mxu1 %v4796_v32  ;;  %4273 = vmatprep.mubr.msk.f32.mxu0 %vm4797_vm5, %v4796_v32 }
 0x9d7   :  { %4239 = vmatpush3.msra.mxu1 %v3861_v62  ;;  %4262 = vmatpush3.msra.mxu0 %v2648_v15 }
 0x9d8   :  { %4240 = vmatprep.subr.mxu1 %v4796_v32  ;;  %4263 = vmatprep.subr.mxu0 %v4796_v32 }
 0x9d9   :  { %4241 = vmatpush3.msra.mxu1 %v3860_v63  ;;  %4264 = vmatpush3.msra.mxu0 %v2647_v16 }
 0x9da   :  { %4242 = vmatprep.subr.mxu1 %v4796_v32  ;;  %4265 = vmatprep.subr.mxu0 %v4796_v32 }
 0x9db   :  { %4243 = vmatpush3.msra.mxu1 %v3859_v0  ;;  %4266 = vmatpush3.msra.mxu0 %v2646_v17 }
 0x9dc   :  { %4244 = vmatprep.subr.mxu1 %v4796_v32  ;;  %4267 = vmatprep.subr.mxu0 %v4796_v32 }
 0x9dd   :  { %4245 = vmatpush3.msra.mxu1 %v3858_v1  ;;  %4268 = vmatpush3.msra.mxu0 %v2645_v18 }
 0x9de   :  { %4246 = vmatprep.subr.mxu1 %v4796_v32  ;;  %4269 = vmatprep.subr.mxu0 %v4796_v32 }
 0x9df   :  { %4247 = vmatpush3.msra.mxu1 %v3857_v2  ;;  %4270 = vmatpush3.msra.mxu0 %v2644_v19 }
 0x9e0   :  { %4248 = vmatprep.subr.mxu1 %v4796_v32  ;;  %4271 = vmatprep.subr.mxu0 %v4796_v32 }
 0x9e1   :  { %4249 = vmatpush3.msra.mxu1 %v3856_v3  ;;  %4272 = vmatpush3.msra.mxu0 %v2643_v20 }
 0x9e2   :  { %4250 = vmatprep.subr.mxu1 %v4796_v32  ;;  %4276 = vmatprep.subr.mxu0 %v4796_v32 }
 0x9e3   :  { %4251 = vmatpush3.msra.mxu1 %v3855_v4 }
 0x9e4   :  { %4252 = vmatprep.subr.mxu1 %v4796_v32 }
 0x9e5   :  { %4253 = vmatpush3.msra.mxu1 %v3854_v5 }
 0x9e6   :  { %4254 = vmatprep.subr.mxu1 %v4796_v32 }
 0x9e7   :  { %4255 = vmatpush3.msra.mxu1 %v3853_v6 }
 0x9e8   :  { %4256 = vmatprep.subr.mxu1 %v4796_v32 }
 0x9e9   :  { %4257 = vmatpush3.msra.mxu1 %v3852_v7 }
 0x9ea   :  { %4291 = vmatprep.subr.mxu1 %v4796_v32 }
 0xa91   :  { %v2376_v8 = vpop.f32.mrf.mxu0  ;;  %v2449_v9 = vpop.f32.mrf.mxu1 }
 0xa92   :  { %v2450_v10 = vadd.f32 %v2449_v9, %v2376_v8  ;;  %v3872_v8 = vld [vmem:[%s5714_s20 + $0x2] sm:$0x3]  ;;  %v2967_v9 = vld [vmem:[%s5714_s20] sm:$0x3] }
 0xa93   :  { %v4201_v11 = vpop.f32.mrf.mxu0  ;;  %v4228_v12 = vpop.f32.mrf.mxu1 }
 0xa94   :  { %v3051_v11 = vld [vmem:[%s5713_s19 + $0x28] sm:$0xff]  ;;  %v3879_v12 = vld [vmem:[%s5713_s19 + $0x50] sm:$0xff] }
 0xa95   :  { %v2524_v13 = vpop.f32.mrf.mxu0 }
 0xa96   :  { %4259 = vmatmul.mubr.msk.f32.vlgmr.msra.gmra.mxu1 %vm1783_vm6, %v2524_v13  ;;  %v3050_v13 = vld [vmem:[%s5713_s19 + $0x20] sm:$0xff] }
 0xa97   :  { %v4233_v14 = vpop.f32.mrf.mxu0  ;;  %4297 = vmatprep.mubr.msk.f32.mxu1 %vm4797_vm5, %v4796_v32  ;;  %4292 = vmatpush3.msra.mxu1 %v2809_v44 }
 0xa98   :  { %4293 = vmatprep.subr.mxu1 %v4796_v32  ;;  %v3878_v14 = vld [vmem:[%s5713_s19 + $0x48] sm:$0xff] }
 0xa99   :  { %4294 = vmatpush3.msra.mxu1 %v2808_v45 }
 0xa9a   :  { %4295 = vmatprep.subr.mxu1 %v4796_v32 }
 0xa9b   :  { %4296 = vmatpush3.msra.mxu1 %v2807_v47 }
 0xa9c   :  { %4309 = vmatprep.subr.mxu1 %v4796_v32 }
 0xb56   :  { %v2610_v21 = vpop.f32.mrf.mxu1 }
 0xb57   :  { %v2614_v24 = vadd.f32 %v2610_v21, %v2450_v10  ;;  %v3880_v10 = vld [vmem:[%s5713_s19 + $0x58] sm:$0xff]  ;;  %v3046_v21 = vld [vmem:[%s5713_s19] sm:$0xff] }
 0xb58   :  { %v4260_v25 = vpop.f32.mrf.mxu1 }
 0xb59   :  { %v2622_v26 = vadd.f32 %v3865_v23, %v2614_v24  ;;  %v3891_v25 = vld [vmem:[%s5713_s19 + $0x88] sm:$0xff] }
 0xb5b   :  { %v5516_v27 = vmax.f32 %v2622_v26, 0.0 }
 0xb5d   :  { %v2625_v28 = vsel %vm2624_vm8, %v5516_v27, 0.0  ;;  %v2634_v52 = vmul.f32 %v5516_v27, %v5516_v27 }
 0xb5e   :  { %v2626_v41 = vrot.slane %v2625_v28, 4 }
 0xb5f   :  { %v2635_v43 = vsel %vm2624_vm8, %v2634_v52, 0.0  ;;  %v3890_v52 = vld [vmem:[%s5713_s19 + $0x80] sm:$0xff] }
 0xb60   :  { %v2627_v46 = vadd.f32 %v2626_v41, %v2625_v28  ;;  %v2636_v29 = vrot.slane %v2635_v43, 4  ;;  %v3889_v41 = vld [vmem:[%s5713_s19 + $0x78] sm:$0xff] }
 0xb62   :  { %v2628_v30 = vrot.slane %v2627_v46, 2  ;;  %v2637_v31 = vadd.f32 %v2636_v29, %v2635_v43  ;;  %v3888_v43 = vld [vmem:[%s5713_s19 + $0x70] sm:$0xff]  ;;  %v3886_v29 = vld [vmem:[%s5713_s19 + $0x60] sm:$0xff] }
 0xb64   :  { %v2629_v33 = vadd.f32 %v2628_v30, %v2627_v46  ;;  %v2638_v35 = vrot.slane %v2637_v31, 2  ;;  %v3887_v46 = vld [vmem:[%s5713_s19 + $0x68] sm:$0xff] }
 0xb66   :  { %v2630_v34 = vrot.slane %v2629_v33, 1  ;;  %v2639_v37 = vadd.f32 %v2638_v35, %v2637_v31 }
 0xb68   :  { %v2631_v36 = vadd.f32 %v2630_v34, %v2629_v33  ;;  %v2640_v39 = vrot.slane %v2639_v37, 1 }
 0xb6a   :  { %v2633_v38 = vmul.f32 0.25, %v2631_v36  ;;  %v2641_v40 = vadd.f32 %v2640_v39, %v2639_v37  ;;  %v3465_v39 = vld [vmem:[#allocation23 + $0x8] sm:$0xff] }
 0xb6c   :  { %4274 = vmatmul.mubr.msk.f32.vlgmr.msra.gmra.mxu0 %vm477_vm1, %v2633_v38  ;;  %v2642_v42 = vmul.f32 0.25, %v2641_v40  ;;  %v3466_v38 = vld [vmem:[#allocation23 + $0x10] sm:$0xff]  ;;  %v3464_v40 = vld [vmem:[#allocation23] sm:$0xff] }
 0xb6d   :  { %4277 = vmatpush3.msra.mxu0 %v2648_v15  ;;  %4288 = vmatprep.mubr.msk.f32.mxu0 %vm4797_vm5, %v4796_v32  ;;  %v3049_v15 = vld [vmem:[%s5713_s19 + $0x18] sm:$0xff] }
 0xb6e   :  { %4278 = vmatprep.subr.mxu0 %v4796_v32 }
 0xb6f   :  { %4279 = vmatpush3.msra.mxu0 %v2647_v16  ;;  %v3877_v16 = vld [vmem:[%s5713_s19 + $0x40] sm:$0xff] }
 0xb70   :  { %4280 = vmatprep.subr.mxu0 %v4796_v32 }
 0xb71   :  { %4281 = vmatpush3.msra.mxu0 %v2646_v17  ;;  %v3048_v17 = vld [vmem:[%s5713_s19 + $0x10] sm:$0xff] }
 0xb72   :  { %4282 = vmatprep.subr.mxu0 %v4796_v32 }
 0xb73   :  { %4283 = vmatpush3.msra.mxu0 %v2645_v18  ;;  %v3876_v18 = vld [vmem:[%s5713_s19 + $0x38] sm:$0xff] }
 0xb74   :  { %4284 = vmatprep.subr.mxu0 %v4796_v32 }
 0xb75   :  { %4285 = vmatpush3.msra.mxu0 %v2644_v19  ;;  %v3875_v19 = vld [vmem:[%s5713_s19 + $0x30] sm:$0xff] }
 0xb76   :  { %4286 = vmatprep.subr.mxu0 %v4796_v32 }
 0xb77   :  { %4287 = vmatpush3.msra.mxu0 %v2643_v20  ;;  %v3047_v20 = vld [vmem:[%s5713_s19 + $0x8] sm:$0xff] }
 0xb78   :  { %4289 = vmatmul.mubr.msk.f32.vlgmr.msra.gmra.mxu0 %vm477_vm1, %v2642_v42  ;;  %4300 = vmatprep.subr.mxu0 %v4796_v32 }
 0xb79   :  { %4306 = vmatprep.mubr.msk.f32.mxu0 %vm4797_vm5, %v4796_v32  ;;  %4301 = vmatpush3.msra.mxu0 %v2809_v44  ;;  %v3893_v44 = vld [vmem:[%s5717_s23] ss:$0 sm:$0xff] }
 0xb7a   :  { %4302 = vmatprep.subr.mxu0 %v4796_v32 }
 0xb7b   :  { %4303 = vmatpush3.msra.mxu0 %v2808_v45 }
 0xb7c   :  { %4304 = vmatprep.subr.mxu0 %v4796_v32 }
 0xb7d   :  { %4305 = vmatpush3.msra.mxu0 %v2807_v47 }
 0xb7e   :  { %4314 = vmatprep.subr.mxu0 %v4796_v32 }
 0xc2c   :  { %v2718_v48 = vpop.f32.mrf.mxu0 }
 0xc2d   :  { %v2795_v50 = vmul.f32 %v2718_v48, %v2718_v48 }
 0xc2e   :  { %v4275_v49 = vpop.f32.mrf.mxu0 }
 0xc38   :  { %v2791_v51 = vpop.f32.mrf.mxu0 }
 0xc39   :  { %v2796_v53 = vsub.f32 %v2791_v51, %v2795_v50 }
 0xc3a   :  { %v4290_v54 = vpop.f32.mrf.mxu0 }
 0xc3b   :  { %v2797_v55 = vmax.f32 %v2796_v53, 0.0 }
 0xc3d   :  { %v2799_v56 = vadd.f32 1e-05, %v2797_v55 }
 0xc3f   :  { %4433 = vrsqrt.f32 %v2799_v56 }
 0xc4c   :  { %v4434_v58 = vpop.eup %4433 }
 0xc4d   :  { %v2801_v59 = vmul.f32 %v4434_v58, %v2798_v57 }
 0xc4f   :  { %v2802_v60 = vmul.f32 %v2801_v59, %v2718_v48  ;;  %4298 = vmatmul.mubr.msk.f32.vlgmr.msra.gmra.mxu1 %vm1078_vm3, %v2801_v59 }
 0xc50   :  { %4311 = vmatprep.mubr.msk.f32.mxu1 %vm4797_vm5, %v4796_v32 }
 0xc51   :  { %v2804_v61 = vrot.slane %v2802_v60, 7 }
 0xc53   :  { %v2806_v62 = vsub.f32 %v2798_v57, %v2804_v61 }
 0xc55   :  { %v2884_v63 = vrot.slane %v2806_v62, 1 }
 0xc57   :  { %4307 = vmatmul.mubr.msk.f32.vlgmr.msra.gmra.mxu0 %vm1078_vm3, %v2884_v63 }
 0xc58   :  { %4316 = vmatprep.mubr.msk.f32.mxu0 %vm4797_vm5, %v4796_v32 }
 0xd0f   :  { %v2879_v0 = vpop.f32.mrf.mxu1 }
 0xd10   :  { %v2960_v2 = vrot.slane %v2879_v0, %v5128_v22 }
 0xd11   :  { %v4299_v1 = vpop.f32.mrf.mxu1 }
 0xd12   :  { %v2961_v4 = vmul.f32 %v2960_v2, %v5516_v27  ;;  %v3883_v27 = vld [vmem:[%s5714_s20 + $0x4] sm:$0x3] }
 0xd17   :  { %v2953_v3 = vpop.f32.mrf.mxu0 }
 0xd18   :  { %v2965_v5 = vrot.slane %v2953_v3, %v5128_v22 }
 0xd19   :  { %v4308_v6 = vpop.f32.mrf.mxu0 }
 0xd1a   :  { %v2966_v7 = vadd.f32 %v2965_v5, %v2961_v4  ;;  %v3627_v4 = vld [vmem:[#allocation25 + $0x10] sm:$0xff]  ;;  %v3626_v5 = vld [vmem:[#allocation25 + $0x8] sm:$0xff]  ;;  %v3625_v6 = vld [vmem:[#allocation25] sm:$0xff] }
 0xd1c   :  { %4310 = vmatpush3.msk.msra.mxu1 %vm2972_vm9, %v2966_v7  ;;  %4315 = vmatpush3.msk.msra.mxu0 %vm2972_vm9, %v2966_v7 }
 0xd1d   :  { %4317 = vmatmul.mubr.msk.f32.vlgmr.msra.gmra.mxu0 %vm2968_vm10, %v3872_v8  ;;  %4312 = vmatmul.mubr.msk.f32.vlgmr.msra.gmra.mxu1 %vm2968_vm10, %v2967_v9 }
 0xd1e   :  { %4319 = vmatprep.subr.mxu1 %v4796_v32  ;;  %4334 = vmatprep.subr.mxu0 %v4796_v32 }
 0xd1f   :  { %4320 = vmatpush3.msra.mxu1 %v3880_v10  ;;  %4335 = vmatpush3.msra.mxu0 %v3051_v11 }
 0xd20   :  { %4321 = vmatprep.subr.mxu1 %v4796_v32  ;;  %4336 = vmatprep.subr.mxu0 %v4796_v32 }
 0xd21   :  { %4322 = vmatpush3.msra.mxu1 %v3879_v12  ;;  %4337 = vmatpush3.msra.mxu0 %v3050_v13 }
 0xd22   :  { %4323 = vmatprep.subr.mxu1 %v4796_v32  ;;  %4338 = vmatprep.subr.mxu0 %v4796_v32 }
 0xd23   :  { %4324 = vmatpush3.msra.mxu1 %v3878_v14  ;;  %4339 = vmatpush3.msra.mxu0 %v3049_v15  ;;  %v3616_v15 = vld [vmem:[%s5718_s24] sm:$0x3]  ;;  %s4737_s24 = scalar_lea.vmem %s3793_s26, 32 }
 0xd24   :  { %4325 = vmatprep.subr.mxu1 %v4796_v32  ;;  %4340 = vmatprep.subr.mxu0 %v4796_v32  ;;  %p4738_p5 = scmp.ne.s32.totalorder %s3793_s26, %s4737_s24  ;;  %p4743_p7 = scmp.lt.s32.totalorder %s4737_s24, %s4737_s24 }
 0xd25   :  { %4326 = vmatpush3.msra.mxu1 %v3877_v16  ;;  %4341 = vmatpush3.msra.mxu0 %v3048_v17 }
 0xd26   :  { %4327 = vmatprep.subr.mxu1 %v4796_v32  ;;  %4331 = vmatprep.mubr.msk.f32.mxu1 %vm4797_vm5, %v4796_v32  ;;  %p4744_p8 = por %p4743_p7, %p4742_p6 }
 0xd27   :  { %4328 = vmatpush3.msra.mxu1 %v3876_v18  ;;  %4342 = vmatprep.subr.mxu0 %v4796_v32 }
 0xd28   :  { %4329 = vmatprep.subr.mxu1 %v4796_v32  ;;  %4346 = vmatprep.mubr.msk.f32.mxu0 %vm4797_vm5, %v4796_v32  ;;  %p4745_p9 = pnand %p4744_p8, %p4738_p5 }
 0xd29   :  { %4330 = vmatpush3.msra.mxu1 %v3875_v19  ;;  %4343 = vmatpush3.msra.mxu0 %v3047_v20 }
 0xd2a   :  { %4349 = vmatprep.subr.mxu1 %v4796_v32  ;;  %4344 = vmatprep.subr.mxu0 %v4796_v32 }
 0xd2b   :  { %4345 = vmatpush3.msra.mxu0 %v3046_v21 }
 0xd2c   :  { %4354 = vmatprep.subr.mxu0 %v4796_v32 }
 0xddd   :  { %v3123_v23 = vpop.f32.mrf.mxu0  ;;  %v3042_v24 = vpop.f32.mrf.mxu1 }
 0xdde   :  { %4332 = vmatmul.mubr.msk.f32.vlgmr.msra.gmra.mxu1 %vm477_vm1, %v3123_v23  ;;  %4347 = vmatmul.mubr.msk.f32.vlgmr.msra.gmra.mxu0 %vm477_vm1, %v3042_v24 }
 0xddf   :  { %4350 = vmatpush3.msk.msra.mxu1 %vm2972_vm9, %v2966_v7  ;;  %v4318_v26 = vpop.f32.mrf.mxu0  ;;  %4351 = vmatprep.mubr.msk.f32.mxu1 %vm4797_vm5, %v4796_v32  ;;  %v4313_v28 = vpop.f32.mrf.mxu1 }
 0xde0   :  { %4355 = vmatpush3.msra.mxu0 %v3891_v25  ;;  %4366 = vmatprep.mubr.msk.f32.mxu0 %vm4797_vm5, %v4796_v32 }
 0xde1   :  { %4356 = vmatprep.subr.mxu0 %v4796_v32  ;;  %4369 = vmatprep.subr.mxu1 %v4796_v32 }
 0xde2   :  { %4352 = vmatmul.mubr.msk.f32.vlgmr.msra.gmra.mxu1 %vm2968_vm10, %v3883_v27  ;;  %4357 = vmatpush3.msra.mxu0 %v3890_v52 }
 0xde3   :  { %4358 = vmatprep.subr.mxu0 %v4796_v32  ;;  %4375 = vmatprep.mubr.msk.f32.mxu1 %vm4797_vm5, %v4796_v32 }
 0xde4   :  { %4359 = vmatpush3.msra.mxu0 %v3889_v41  ;;  %4370 = vmatpush3.msra.mxu1 %v3466_v38 }
 0xde5   :  { %4360 = vmatprep.subr.mxu0 %v4796_v32  ;;  %4371 = vmatprep.subr.mxu1 %v4796_v32 }
 0xde6   :  { %4361 = vmatpush3.msra.mxu0 %v3888_v43  ;;  %4372 = vmatpush3.msra.mxu1 %v3465_v39 }
 0xde7   :  { %4362 = vmatprep.subr.mxu0 %v4796_v32  ;;  %4373 = vmatprep.subr.mxu1 %v4796_v32 }
 0xde8   :  { %4363 = vmatpush3.msra.mxu0 %v3887_v46  ;;  %4374 = vmatpush3.msra.mxu1 %v3464_v40 }
 0xde9   :  { %4364 = vmatprep.subr.mxu0 %v4796_v32  ;;  %4378 = vmatprep.subr.mxu1 %v4796_v32 }
 0xdea   :  { %4365 = vmatpush3.msra.mxu0 %v3886_v29 }
 0xdeb   :  { %4387 = vmatprep.subr.mxu0 %v4796_v32 }
 0xe9e   :  { %v3203_v30 = vpop.f32.mrf.mxu1  ;;  %v3276_v31 = vpop.f32.mrf.mxu0 }
 0xe9f   :  { %v3277_v33 = vadd.f32 %v3276_v31, %v3203_v30 }
 0xea0   :  { %v4333_v34 = vpop.f32.mrf.mxu1  ;;  %v4348_v35 = vpop.f32.mrf.mxu0 }
 0xea2   :  { %v3351_v36 = vpop.f32.mrf.mxu1 }
 0xea3   :  { %4367 = vmatmul.mubr.msk.f32.vlgmr.msra.gmra.mxu0 %vm477_vm1, %v3351_v36 }
 0xea4   :  { %v4353_v37 = vpop.f32.mrf.mxu1  ;;  %4393 = vmatprep.mubr.msk.f32.mxu0 %vm4797_vm5, %v4796_v32  ;;  %4388 = vmatpush3.msra.mxu0 %v3627_v4 }
 0xea5   :  { %4389 = vmatprep.subr.mxu0 %v4796_v32 }
 0xea6   :  { %4390 = vmatpush3.msra.mxu0 %v3626_v5 }
 0xea7   :  { %4391 = vmatprep.subr.mxu0 %v4796_v32 }
 0xea8   :  { %4392 = vmatpush3.msra.mxu0 %v3625_v6 }
 0xf63   :  { %v3431_v42 = vpop.f32.mrf.mxu0 }
 0xf64   :  { %v3435_v45 = vadd.f32 %v3431_v42, %v3277_v33 }
 0xf65   :  { %v4368_v47 = vpop.f32.mrf.mxu0 }
 0xf66   :  { %v3443_v48 = vadd.f32 %v3893_v44, %v3435_v45 }
 0xf68   :  { %v5662_v49 = vmax.f32 %v3443_v48, 0.0 }
 0xf6a   :  { %v3446_v50 = vsel %vm3445_vm11, %v5662_v49, 0.0  ;;  %v3455_v51 = vmul.f32 %v5662_v49, %v5662_v49 }
 0xf6b   :  { %v3447_v53 = vrot.slane %v3446_v50, 4 }
 0xf6c   :  { %v3456_v54 = vsel %vm3445_vm11, %v3455_v51, 0.0 }
 0xf6d   :  { %v3448_v55 = vadd.f32 %v3447_v53, %v3446_v50  ;;  %v3457_v56 = vrot.slane %v3456_v54, 4 }
 0xf6f   :  { %v3449_v57 = vrot.slane %v3448_v55, 2  ;;  %v3458_v58 = vadd.f32 %v3457_v56, %v3456_v54 }
 0xf71   :  { %v3450_v59 = vadd.f32 %v3449_v57, %v3448_v55  ;;  %v3459_v60 = vrot.slane %v3458_v58, 2 }
 0xf73   :  { %v3451_v61 = vrot.slane %v3450_v59, 1  ;;  %v3460_v62 = vadd.f32 %v3459_v60, %v3458_v58 }
 0xf75   :  { %v3452_v63 = vadd.f32 %v3451_v61, %v3450_v59  ;;  %v3461_v0 = vrot.slane %v3460_v62, 1 }
 0xf77   :  { %v3454_v1 = vmul.f32 0.5, %v3452_v63  ;;  %v3462_v2 = vadd.f32 %v3461_v0, %v3460_v62 }
 0xf79   :  { %4376 = vmatmul.mubr.msk.f32.vlgmr.msra.gmra.mxu1 %vm1078_vm3, %v3454_v1  ;;  %v3463_v3 = vmul.f32 0.5, %v3462_v2 }
 0xf7a   :  { %4379 = vmatpush3.msra.mxu1 %v3466_v38  ;;  %4384 = vmatprep.mubr.msk.f32.mxu1 %vm4797_vm5, %v4796_v32 }
 0xf7b   :  { %4380 = vmatprep.subr.mxu1 %v4796_v32 }
 0xf7c   :  { %4381 = vmatpush3.msra.mxu1 %v3465_v39 }
 0xf7d   :  { %4382 = vmatprep.subr.mxu1 %v4796_v32 }
 0xf7e   :  { %4383 = vmatpush3.msra.mxu1 %v3464_v40 }
 0xf7f   :  { %4385 = vmatmul.mubr.msk.f32.vlgmr.msra.gmra.mxu1 %vm1078_vm3, %v3463_v3  ;;  %4396 = vmatprep.subr.mxu1 %v4796_v32 }
 0xf80   :  { %4402 = vmatprep.mubr.msk.f32.mxu1 %vm4797_vm5, %v4796_v32  ;;  %4397 = vmatpush3.msra.mxu1 %v3627_v4 }
 0xf81   :  { %4398 = vmatprep.subr.mxu1 %v4796_v32 }
 0xf82   :  { %4399 = vmatpush3.msra.mxu1 %v3626_v5 }
 0xf83   :  { %4400 = vmatprep.subr.mxu1 %v4796_v32 }
 0xf84   :  { %4401 = vmatpush3.msra.mxu1 %v3625_v6 }
0x1039   :  { %v3536_v7 = vpop.f32.mrf.mxu1 }
0x103a   :  { %v3613_v9 = vmul.f32 %v3536_v7, %v3536_v7 }
0x103b   :  { %v4377_v8 = vpop.f32.mrf.mxu1 }
0x103f   :  { %v3609_v10 = vpop.f32.mrf.mxu1 }
0x1040   :  { %v3614_v11 = vsub.f32 %v3609_v10, %v3613_v9 }
0x1041   :  { %v4386_v12 = vpop.f32.mrf.mxu1 }
0x1042   :  { %v3615_v13 = vmax.f32 %v3614_v11, 0.0 }
0x1044   :  { %v3617_v14 = vadd.f32 1e-05, %v3615_v13 }
0x1046   :  { %4435 = vrsqrt.f32 %v3617_v14 }
0x1053   :  { %v4436_v16 = vpop.eup %4435 }
0x1054   :  { %v3619_v17 = vmul.f32 %v4436_v16, %v3616_v15 }
0x1056   :  { %v3620_v18 = vmul.f32 %v3619_v17, %v3536_v7  ;;  %4394 = vmatmul.mubr.msk.f32.vlgmr.msra.gmra.mxu0 %vm1078_vm3, %v3619_v17 }
0x1058   :  { %v3622_v32 = vrot.slane %v3620_v18, 7 }
0x105a   :  { %v3624_v19 = vsub.f32 %v3616_v15, %v3622_v32 }
0x105c   :  { %v3702_v20 = vrot.slane %v3624_v19, 1 }
0x105e   :  { %4403 = vmatmul.mubr.msk.f32.vlgmr.msra.gmra.mxu1 %vm1078_vm3, %v3702_v20 }
0x1116   :  { %v3697_v21 = vpop.f32.mrf.mxu0 }
0x1117   :  { %v3778_v24 = vrot.slane %v3697_v21, %v5128_v22 }
0x1118   :  { %v4395_v23 = vpop.f32.mrf.mxu0 }
0x1119   :  { %v3779_v26 = vmul.f32 %v3778_v24, %v5662_v49 }
0x111e   :  { %v3771_v25 = vpop.f32.mrf.mxu1 }
0x111f   :  { %v3783_v27 = vrot.slane %v3771_v25, %v5128_v22 }
0x1120   :  { %v4404_v28 = vpop.f32.mrf.mxu1 }
0x1121   :  { %v3784_v52 = vadd.f32 %v3783_v27, %v3779_v26 }
0x1123   :  { %3785 = vst.msk [vmem:[#allocation26] sm:$0x3] %vm3445_vm11, %v3784_v52 }
0x1124   :  { %4748 = shalt.err (!%p4745_p9)
}
0x1125   :  { %3795 = dma.vmem_to_hbm [thread:$0]  %s3793_s26, 32, %s5719_s25, [#allocation4]  }
0x1126   :  { %4773 = dma.done.wait [#allocation4], 32  }
0x1127   :  { %4774 = vsyncadd [#allocation4], 4294967264 }
0x1128   :  { %3799 = vsyncpa [#allocation3], 1 }
0x1129   :  { %3800 = vsyncpa [#allocation6], 1 }
0x112a   :  { %3801 = vsyncpa [#allocation9], 1 }
0x112b   :  { %3802 = vsyncpa [#allocation12], 1 }
0x112c   :  { %3803 = vsyncpa [#allocation15], 1 }
0x112d   :  { %3804 = vsyncpa [#allocation18], 1 }
0x112e   :  { %3805 = vsyncpa [#allocation21], 1 }
0x112f   :  { %3806 = vsyncpa [#allocation24], 1 }
0x1130   :  { %3807 = vsyncpa [#allocation4], 1 }

</bundles_post_ra>
